<compile_context>
chip_gen: v7x
topology: tpu7x:2x2x1
jax: 0.10.0
libtpu: 0.0.40
codegen_flags: <defaults>
</compile_context>

<pallas_src>
import math
import functools

import jax
import jax.numpy as jnp
from jax import lax
from jax.experimental import pallas as pl
from jax.experimental.pallas import tpu as pltpu


# ----------------------------------------------------------------------------
# In-kernel helpers (operate on values, not refs)
# ----------------------------------------------------------------------------

def _layernorm(x, g, b, eps=1e-5):
    mu = jnp.mean(x, axis=-1, keepdims=True)
    var = jnp.mean(jnp.square(x - mu), axis=-1, keepdims=True)
    return (x - mu) * lax.rsqrt(var + eps) * g + b


def _gelu_tanh(x):
    c = 0.7978845608028654  # sqrt(2/pi)
    return 0.5 * x * (1.0 + jnp.tanh(c * (x + 0.044715 * x * x * x)))


def _bf16(x):
    return x.astype(jnp.bfloat16)


# ----------------------------------------------------------------------------
# Fused decoder kernel: one program = one batch block; layer loop is in-kernel.
# ----------------------------------------------------------------------------

def _make_decoder_kernel(*, n_layer, n_head, t_total, t_out, d_model, batch_block):
    hd = d_model // n_head
    scale = 1.0 / math.sqrt(hd)
    T = t_total
    Bb = batch_block

    def kernel(z_ref, qpw_ref, qpb_ref, pos_ref, mask_ref,
               ln1g_ref, ln1b_ref, wqkv_ref, bqkv_ref, wproj_ref, bproj_ref,
               ln2g_ref, ln2b_ref, wfc_ref, bfc_ref, wfc2_ref, bfc2_ref,
               lnfg_ref, lnfb_ref, wout_ref, bout_ref,
               logits_ref, x_scr):
        # ---- prologue: build [mask_tokens ; quant_proj(z)+pos] per element ----
        for bb in range(Bb):                               # static, Bb is small
            z_emb = (jnp.dot(_bf16(z_ref[bb]), qpw_ref[...],
                             preferred_element_type=jnp.float32)
                     + qpb_ref[...] + pos_ref[...])        # [Lt, D]
            r0 = bb * T
            x_scr[r0:r0 + t_out, :] = mask_ref[...]        # mask tokens first
            x_scr[r0 + t_out:r0 + T, :] = z_emb            # then latent tokens

        # ---- transformer layers: in-kernel loop, weights VMEM-resident ----
        @pl.loop(0, n_layer)
        def _(l):
            x = x_scr[...]                                 # [Bb*T, D] f32 residual

            # attention sub-block (pre-LN)
            h = _layernorm(x, ln1g_ref[l], ln1b_ref[l])
            qkv = (jnp.dot(_bf16(h), wqkv_ref[l],
                           preferred_element_type=jnp.float32)
                   + bqkv_ref[l])                          # [Bb*T, 3D]
            wproj = wproj_ref[l]                           # [D, D] bf16
            for bb in range(Bb):                           # attention is per-element
                r0 = bb * T
                acc = bproj_ref[l]                         # (1, D) f32, broadcasts
                for hh in range(n_head):                   # static; H small here
                    q = qkv[r0:r0 + T, hh * hd:(hh + 1) * hd]
                    k = qkv[r0:r0 + T, d_model + hh * hd:d_model + (hh + 1) * hd]
                    v = qkv[r0:r0 + T, 2 * d_model + hh * hd:2 * d_model + (hh + 1) * hd]
                    s = lax.dot_general(
                        _bf16(q), _bf16(k), (((1,), (1,)), ((), ())),
                        preferred_element_type=jnp.float32) * scale   # [T, T]
                    m = jnp.max(s, axis=-1, keepdims=True)
                    p = jnp.exp(s - m)
                    p = p * pl.reciprocal(jnp.sum(p, axis=-1, keepdims=True),
                                          approx=True)
                    o = jnp.dot(_bf16(p), _bf16(v),
                                preferred_element_type=jnp.float32)   # [T, hd]
                    # head-merge fused into the output projection (no concat)
                    acc = acc + jnp.dot(
                        _bf16(o), wproj[hh * hd:(hh + 1) * hd, :],
                        preferred_element_type=jnp.float32)
                x_scr[r0:r0 + T, :] = x[r0:r0 + T, :] + acc            # residual add

            # MLP sub-block (pre-LN), batch*tokens flattened into M
            x = x_scr[...]
            h = _layernorm(x, ln2g_ref[l], ln2b_ref[l])
            f = (jnp.dot(_bf16(h), wfc_ref[l], preferred_element_type=jnp.float32)
                 + bfc_ref[l])
            f = _gelu_tanh(f)
            g = (jnp.dot(_bf16(f), wfc2_ref[l], preferred_element_type=jnp.float32)
                 + bfc2_ref[l])
            x_scr[...] = x + g

        # ---- epilogue: final LN + output head (lane-dense padded codebook) ----
        xf = _layernorm(x_scr[...], lnfg_ref[...], lnfb_ref[...])
        for bb in range(Bb):
            tok = xf[bb * T:bb * T + t_out, :]             # first vq_latent_tokens rows
            logits_ref[bb] = (jnp.dot(_bf16(tok), wout_ref[...],
                                      preferred_element_type=jnp.float32)
                              + bout_ref[...])

    return kernel


# ----------------------------------------------------------------------------
# Wrapper
# ----------------------------------------------------------------------------

def titok_decoder_forward(params, cfg, z, *, batch_block=1):
    """z: float32 [B, latent_tokens, latent_dim] -> logits [B, vq_latent_tokens, vq_codebook_size]."""
    B, Lt, Dl = z.shape
    D = cfg["n_embd"]
    H = cfg["n_head"]
    TV = cfg["vq_latent_tokens"]
    C = cfg["vq_codebook_size"]
    L = cfg["n_layer"]
    T = TV + Lt
    Bb = batch_block
    assert B % Bb == 0, "batch_block must divide batch"

    # Lane-dense output head: pad codebook axis to a multiple of 128 lanes.
    Cpad = ((C + 127) // 128) * 128
    wout = params["emb_proj_w"]
    bout = params["emb_proj_b"]
    if Cpad != C:
        wout = jnp.pad(wout, ((0, 0), (0, Cpad - C)))
        bout = jnp.pad(bout, ((0, 0), (0, Cpad - C)))

    blk = params["blocks"]
    kernel = _make_decoder_kernel(n_layer=L, n_head=H, t_total=T, t_out=TV,
                                  d_model=D, batch_block=Bb)

    def resident(shp):
        # Whole array, VMEM-resident, same block for every grid step.
        return pl.BlockSpec(shp, lambda g: (0,) * len(shp))

    in_specs = [
        pl.BlockSpec((Bb, Lt, Dl), lambda g: (g, 0, 0)),   # z
        resident((Dl, D)),                                 # quant_proj_w (bf16)
        resident((1, D)),                                  # quant_proj_b
        resident((Lt, D)),                                 # pos_emb
        resident((TV, D)),                                 # mask_tokens
        resident((L, 1, D)),                               # ln1_g
        resident((L, 1, D)),                               # ln1_b
        resident((L, D, 3 * D)),                           # wqkv (bf16)
        resident((L, 1, 3 * D)),                           # bqkv
        resident((L, D, D)),                               # wproj (bf16)
        resident((L, 1, D)),                               # bproj
        resident((L, 1, D)),                               # ln2_g
        resident((L, 1, D)),                               # ln2_b
        resident((L, D, 4 * D)),                           # wfc (bf16)
        resident((L, 1, 4 * D)),                           # bfc
        resident((L, 4 * D, D)),                           # wfc2 (bf16)
        resident((L, 1, D)),                               # bfc2
        resident((1, D)),                                  # lnf_g
        resident((1, D)),                                  # lnf_b
        resident((D, Cpad)),                               # emb_proj_w (bf16, padded)
        resident((1, Cpad)),                               # emb_proj_b (padded)
    ]
    out_spec = pl.BlockSpec((Bb, TV, Cpad), lambda g: (g, 0, 0))

    operands = (
        z,
        params["quant_proj_w"], params["quant_proj_b"],
        params["pos_emb"], params["mask_tokens"],
        blk["ln1_g"], blk["ln1_b"], blk["wqkv"], blk["bqkv"],
        blk["wproj"], blk["bproj"],
        blk["ln2_g"], blk["ln2_b"], blk["wfc"], blk["bfc"],
        blk["wfc2"], blk["bfc2"],
        params["lnf_g"], params["lnf_b"],
        wout, bout,
    )

    # Advisory cost estimate so XLA schedules the fused call sensibly.
    mm_flops = B * (
        L * (2 * T * D * 3 * D        # qkv
             + 4 * T * T * D          # scores + p@v over all heads
             + 2 * T * D * D          # output projection
             + 16 * T * D * D)        # MLP (two D<->4D matmuls)
        + 2 * Lt * Dl * D             # quant_proj
        + 2 * TV * D * Cpad)          # output head
    transcendentals = B * L * (H * T * T + T * 4 * D)      # softmax exp + gelu tanh
    bytes_accessed = (sum(int(a.size) * a.dtype.itemsize for a in operands)
                      + B * TV * Cpad * 4)
    cost = pl.CostEstimate(flops=int(mm_flops),
                           transcendentals=int(transcendentals),
                           bytes_accessed=int(bytes_accessed))

    logits_padded = pl.pallas_call(
        kernel,
        out_shape=jax.ShapeDtypeStruct((B, TV, Cpad), jnp.float32),
        grid=(B // Bb,),
        in_specs=in_specs,
        out_specs=out_spec,
        scratch_shapes=[pltpu.VMEM((Bb * T, D), jnp.float32)],   # resident activation
        compiler_params=pltpu.CompilerParams(
            dimension_semantics=("parallel",),                   # batch across TCs (v7x)
            vmem_limit_bytes=32 * 1024 * 1024,
        ),
        cost_estimate=cost,
    )(*operands)

    return logits_padded[:, :, :C]


# ----------------------------------------------------------------------------
# Deterministic parameter init (matmul weights stored in bf16, stacked per layer)
# ----------------------------------------------------------------------------

def _trunc_normal(key, shape, std=0.02, dtype=jnp.float32):
    return (jax.random.truncated_normal(key, -2.0, 2.0, shape, jnp.float32) * std).astype(dtype)


def init_params(cfg, key):
    D = cfg["n_embd"]
    Dl = cfg["latent_dim"]
    L = cfg["n_layer"]
    TV = cfg["vq_latent_tokens"]
    Lt = cfg["latent_tokens"]
    C = cfg["vq_codebook_size"]
    bf16 = jnp.bfloat16
    keys = jax.random.split(key, 9)
    blocks = dict(
        ln1_g=jnp.ones((L, 1, D), jnp.float32),
        ln1_b=jnp.zeros((L, 1, D), jnp.float32),
        wqkv=_trunc_normal(keys[0], (L, D, 3 * D), dtype=bf16),
        bqkv=jnp.zeros((L, 1, 3 * D), jnp.float32),
        wproj=_trunc_normal(keys[1], (L, D, D), dtype=bf16),
        bproj=jnp.zeros((L, 1, D), jnp.float32),
        ln2_g=jnp.ones((L, 1, D), jnp.float32),
        ln2_b=jnp.zeros((L, 1, D), jnp.float32),
        wfc=_trunc_normal(keys[2], (L, D, 4 * D), dtype=bf16),
        bfc=jnp.zeros((L, 1, 4 * D), jnp.float32),
        wfc2=_trunc_normal(keys[3], (L, 4 * D, D), dtype=bf16),
        bfc2=jnp.zeros((L, 1, D), jnp.float32),
    )
    return dict(
        blocks=blocks,
        lnf_g=jnp.ones((1, D), jnp.float32),
        lnf_b=jnp.zeros((1, D), jnp.float32),
        quant_proj_w=_trunc_normal(keys[4], (Dl, D), dtype=bf16),
        quant_proj_b=jnp.zeros((1, D), jnp.float32),
        pos_emb=jax.random.normal(keys[5], (Lt, D), jnp.float32) * D ** -0.5,
        mask_tokens=_trunc_normal(keys[6], (TV, D)),
        emb_proj_w=_trunc_normal(keys[7], (D, C), dtype=bf16),
        emb_proj_b=jnp.zeros((1, C), jnp.float32),
    )


# ----------------------------------------------------------------------------
# Main
# ----------------------------------------------------------------------------

if __name__ == "__main__":
    cfg = dict(
        vq_codebook_size=64,
        vq_latent_tokens=16,
        latent_tokens=8,
        latent_dim=16,
        n_embd=64,
        n_head=4,
        n_layer=2,
    )
    key = jax.random.PRNGKey(0)
    pkey, zkey = jax.random.split(key)
    params = init_params(cfg, pkey)

    B = 2
    z = jax.random.normal(zkey, (B, cfg["latent_tokens"], cfg["latent_dim"]), jnp.float32)

    # Bb=1 -> one batch element per program (keeps both TCs busy on v7x for B=2);
    # raise batch_block for larger batches to amortize weight DMA per program.
    fwd = jax.jit(functools.partial(titok_decoder_forward, params, cfg, batch_block=1))
    logits = fwd(z)
    jax.block_until_ready(logits)

    assert logits.shape == (B, cfg["vq_latent_tokens"], cfg["vq_codebook_size"])
    assert bool(jnp.all(jnp.isfinite(logits)))

    print("KERNEL_OK")
</pallas_src>

<mosaic_0001>
module attributes {stable_mosaic.version = 11 : i64} {
  func.func @kernel(%arg0: i32, %arg1: memref<1x8x16xf32, #tpu.memory_space<vmem>>, %arg2: memref<16x64xbf16, #tpu.memory_space<vmem>>, %arg3: memref<1x64xf32, #tpu.memory_space<vmem>>, %arg4: memref<8x64xf32, #tpu.memory_space<vmem>>, %arg5: memref<16x64xf32, #tpu.memory_space<vmem>>, %arg6: memref<2x1x64xf32, #tpu.memory_space<vmem>>, %arg7: memref<2x1x64xf32, #tpu.memory_space<vmem>>, %arg8: memref<2x64x192xbf16, #tpu.memory_space<vmem>>, %arg9: memref<2x1x192xf32, #tpu.memory_space<vmem>>, %arg10: memref<2x64x64xbf16, #tpu.memory_space<vmem>>, %arg11: memref<2x1x64xf32, #tpu.memory_space<vmem>>, %arg12: memref<2x1x64xf32, #tpu.memory_space<vmem>>, %arg13: memref<2x1x64xf32, #tpu.memory_space<vmem>>, %arg14: memref<2x64x256xbf16, #tpu.memory_space<vmem>>, %arg15: memref<2x1x256xf32, #tpu.memory_space<vmem>>, %arg16: memref<2x256x64xbf16, #tpu.memory_space<vmem>>, %arg17: memref<2x1x64xf32, #tpu.memory_space<vmem>>, %arg18: memref<1x64xf32, #tpu.memory_space<vmem>>, %arg19: memref<1x64xf32, #tpu.memory_space<vmem>>, %arg20: memref<64x128xbf16, #tpu.memory_space<vmem>>, %arg21: memref<1x128xf32, #tpu.memory_space<vmem>>, %arg22: memref<1x16x128xf32, #tpu.memory_space<vmem>>, %arg23: memref<24x64xf32, #tpu.memory_space<vmem>>) attributes {dimension_semantics = [#tpu.dimension_semantics<parallel>], iteration_bounds = array<i64: 2>, scalar_prefetch = 0 : i64, scratch_operands = 1 : i64, tpu.core_type = #tpu.core_type<tc>, window_params = [{transform_indices = @transform_0, window_bounds = array<i64: 1, 8, 16>}, {pipeline_mode = #tpu.pipeline_mode<synchronous>, transform_indices = @transform_1, window_bounds = array<i64: 16, 64>}, {pipeline_mode = #tpu.pipeline_mode<synchronous>, transform_indices = @transform_2, window_bounds = array<i64: 1, 64>}, {pipeline_mode = #tpu.pipeline_mode<synchronous>, transform_indices = @transform_3, window_bounds = array<i64: 8, 64>}, {pipeline_mode = #tpu.pipeline_mode<synchronous>, transform_indices = @transform_4, window_bounds = array<i64: 16, 64>}, {pipeline_mode = #tpu.pipeline_mode<synchronous>, transform_indices = @transform_5, window_bounds = array<i64: 2, 1, 64>}, {pipeline_mode = #tpu.pipeline_mode<synchronous>, transform_indices = @transform_6, window_bounds = array<i64: 2, 1, 64>}, {pipeline_mode = #tpu.pipeline_mode<synchronous>, transform_indices = @transform_7, window_bounds = array<i64: 2, 64, 192>}, {pipeline_mode = #tpu.pipeline_mode<synchronous>, transform_indices = @transform_8, window_bounds = array<i64: 2, 1, 192>}, {pipeline_mode = #tpu.pipeline_mode<synchronous>, transform_indices = @transform_9, window_bounds = array<i64: 2, 64, 64>}, {pipeline_mode = #tpu.pipeline_mode<synchronous>, transform_indices = @transform_10, window_bounds = array<i64: 2, 1, 64>}, {pipeline_mode = #tpu.pipeline_mode<synchronous>, transform_indices = @transform_11, window_bounds = array<i64: 2, 1, 64>}, {pipeline_mode = #tpu.pipeline_mode<synchronous>, transform_indices = @transform_12, window_bounds = array<i64: 2, 1, 64>}, {pipeline_mode = #tpu.pipeline_mode<synchronous>, transform_indices = @transform_13, window_bounds = array<i64: 2, 64, 256>}, {pipeline_mode = #tpu.pipeline_mode<synchronous>, transform_indices = @transform_14, window_bounds = array<i64: 2, 1, 256>}, {pipeline_mode = #tpu.pipeline_mode<synchronous>, transform_indices = @transform_15, window_bounds = array<i64: 2, 256, 64>}, {pipeline_mode = #tpu.pipeline_mode<synchronous>, transform_indices = @transform_16, window_bounds = array<i64: 2, 1, 64>}, {pipeline_mode = #tpu.pipeline_mode<synchronous>, transform_indices = @transform_17, window_bounds = array<i64: 1, 64>}, {pipeline_mode = #tpu.pipeline_mode<synchronous>, transform_indices = @transform_18, window_bounds = array<i64: 1, 64>}, {pipeline_mode = #tpu.pipeline_mode<synchronous>, transform_indices = @transform_19, window_bounds = array<i64: 64, 128>}, {pipeline_mode = #tpu.pipeline_mode<synchronous>, transform_indices = @transform_20, window_bounds = array<i64: 1, 128>}, {transform_indices = @transform_21, window_bounds = array<i64: 1, 16, 128>}]} {
    %c0 = arith.constant 0 : index
    %c0_0 = arith.constant 0 : index
    %c0_1 = arith.constant 0 : index
    %0 = vector.load %arg1[%c0, %c0_0, %c0_1] : memref<1x8x16xf32, #tpu.memory_space<vmem>>, vector<1x8x16xf32>
    %1 = vector.shape_cast %0 : vector<1x8x16xf32> to vector<8x16xf32>
    %2 = arith.truncf %1 : vector<8x16xf32> to vector<8x16xbf16>
    %c0_2 = arith.constant 0 : index
    %c0_3 = arith.constant 0 : index
    %3 = vector.load %arg2[%c0_2, %c0_3] : memref<16x64xbf16, #tpu.memory_space<vmem>>, vector<16x64xbf16>
    %cst = arith.constant dense<0.000000e+00> : vector<8x64xf32>
    %4 = tpu.matmul %2, %3, %cst {dimension_numbers = #tpu.dot_dimension_numbers<[1], [0], [0], [1], [0, 0, 1, 1], [], []>} : vector<8x16xbf16>, vector<16x64xbf16>, vector<8x64xf32> -> vector<8x64xf32>
    %c0_4 = arith.constant 0 : index
    %c0_5 = arith.constant 0 : index
    %5 = vector.load %arg3[%c0_4, %c0_5] : memref<1x64xf32, #tpu.memory_space<vmem>>, vector<1x64xf32>
    %6 = vector.broadcast %5 : vector<1x64xf32> to vector<8x64xf32>
    %7 = arith.addf %4, %6 : vector<8x64xf32>
    %c0_6 = arith.constant 0 : index
    %c0_7 = arith.constant 0 : index
    %8 = vector.load %arg4[%c0_6, %c0_7] : memref<8x64xf32, #tpu.memory_space<vmem>>, vector<8x64xf32>
    %9 = arith.addf %7, %8 : vector<8x64xf32>
    %c0_8 = arith.constant 0 : index
    %c0_9 = arith.constant 0 : index
    %10 = vector.load %arg5[%c0_8, %c0_9] : memref<16x64xf32, #tpu.memory_space<vmem>>, vector<16x64xf32>
    %c0_10 = arith.constant 0 : index
    %c0_11 = arith.constant 0 : index
    %11 = vector.load %arg23[%c0_10, %c0_11] : memref<24x64xf32, #tpu.memory_space<vmem>>, vector<16x64xf32>
    tpu.vector_store %arg23[%c0_10, %c0_11], %10 {strides = array<i32>} : memref<24x64xf32, #tpu.memory_space<vmem>>, vector<16x64xf32>,
    %c16 = arith.constant 16 : index
    %c0_12 = arith.constant 0 : index
    %12 = vector.load %arg23[%c16, %c0_12] : memref<24x64xf32, #tpu.memory_space<vmem>>, vector<8x64xf32>
    tpu.vector_store %arg23[%c16, %c0_12], %9 {strides = array<i32>} : memref<24x64xf32, #tpu.memory_space<vmem>>, vector<8x64xf32>,
    %c0_i32 = arith.constant 0 : i32
    %c2_i32 = arith.constant 2 : i32
    %13 = arith.addi %c0_i32, %c2_i32 : i32
    %c1_i32 = arith.constant 1 : i32
    scf.for %arg24 = %c0_i32 to %13 step %c1_i32  : i32 {
      %c1_i32_33 = arith.constant 1 : i32
      %49 = arith.muli %arg24, %c1_i32_33 : i32
      %c0_i32_34 = arith.constant 0 : i32
      %50 = arith.addi %c0_i32_34, %49 : i32
      %c0_35 = arith.constant 0 : index
      %c0_36 = arith.constant 0 : index
      %51 = vector.load %arg23[%c0_35, %c0_36] : memref<24x64xf32, #tpu.memory_space<vmem>>, vector<24x64xf32>
      %52 = arith.index_cast %50 : i32 to index
      %c0_37 = arith.constant 0 : index
      %c0_38 = arith.constant 0 : index
      %53 = vector.load %arg6[%52, %c0_37, %c0_38] : memref<2x1x64xf32, #tpu.memory_space<vmem>>, vector<1x1x64xf32>
      %54 = vector.shape_cast %53 : vector<1x1x64xf32> to vector<1x64xf32>
      %55 = arith.index_cast %50 : i32 to index
      %c0_39 = arith.constant 0 : index
      %c0_40 = arith.constant 0 : index
      %56 = vector.load %arg7[%55, %c0_39, %c0_40] : memref<2x1x64xf32, #tpu.memory_space<vmem>>, vector<1x1x64xf32>
      %57 = vector.shape_cast %56 : vector<1x1x64xf32> to vector<1x64xf32>
      %cst_41 = arith.constant dense<0.000000e+00> : vector<24xf32>
      %58 = vector.multi_reduction <add>, %51, %cst_41 [1] : vector<24x64xf32> to vector<24xf32>
      %59 = vector.shape_cast %58 : vector<24xf32> to vector<24x1xf32>
      %cst_42 = arith.constant 6.400000e+01 : f32
      %60 = vector.broadcast %cst_42 : f32 to vector<24x1xf32>
      %61 = arith.divf %59, %60 : vector<24x1xf32>
      %62 = vector.broadcast %61 : vector<24x1xf32> to vector<24x64xf32>
      %63 = arith.subf %51, %62 : vector<24x64xf32>
      %64 = arith.mulf %63, %63 : vector<24x64xf32>
      %cst_43 = arith.constant dense<0.000000e+00> : vector<24xf32>
      %65 = vector.multi_reduction <add>, %64, %cst_43 [1] : vector<24x64xf32> to vector<24xf32>
      %66 = vector.shape_cast %65 : vector<24xf32> to vector<24x1xf32>
      %cst_44 = arith.constant 6.400000e+01 : f32
      %67 = vector.broadcast %cst_44 : f32 to vector<24x1xf32>
      %68 = arith.divf %66, %67 : vector<24x1xf32>
      %69 = vector.broadcast %61 : vector<24x1xf32> to vector<24x64xf32>
      %70 = arith.subf %51, %69 : vector<24x64xf32>
      %cst_45 = arith.constant 9.99999974E-6 : f32
      %71 = vector.broadcast %cst_45 : f32 to vector<24x1xf32>
      %72 = arith.addf %68, %71 : vector<24x1xf32>
      %73 = math.rsqrt %72 : vector<24x1xf32>
      %74 = vector.broadcast %73 : vector<24x1xf32> to vector<24x64xf32>
      %75 = arith.mulf %70, %74 : vector<24x64xf32>
      %76 = vector.broadcast %54 : vector<1x64xf32> to vector<24x64xf32>
      %77 = arith.mulf %75, %76 : vector<24x64xf32>
      %78 = vector.broadcast %57 : vector<1x64xf32> to vector<24x64xf32>
      %79 = arith.addf %77, %78 : vector<24x64xf32>
      %80 = arith.truncf %79 : vector<24x64xf32> to vector<24x64xbf16>
      %81 = arith.index_cast %50 : i32 to index
      %c0_46 = arith.constant 0 : index
      %c0_47 = arith.constant 0 : index
      %82 = vector.load %arg8[%81, %c0_46, %c0_47] : memref<2x64x192xbf16, #tpu.memory_space<vmem>>, vector<1x64x192xbf16>
      %83 = vector.shape_cast %82 : vector<1x64x192xbf16> to vector<64x192xbf16>
      %cst_48 = arith.constant dense<0.000000e+00> : vector<24x192xf32>
      %84 = tpu.matmul %80, %83, %cst_48 {dimension_numbers = #tpu.dot_dimension_numbers<[1], [0], [0], [1], [0, 0, 1, 1], [], []>} : vector<24x64xbf16>, vector<64x192xbf16>, vector<24x192xf32> -> vector<24x192xf32>
      %85 = arith.index_cast %50 : i32 to index
      %c0_49 = arith.constant 0 : index
      %c0_50 = arith.constant 0 : index
      %86 = vector.load %arg9[%85, %c0_49, %c0_50] : memref<2x1x192xf32, #tpu.memory_space<vmem>>, vector<1x1x192xf32>
      %87 = vector.shape_cast %86 : vector<1x1x192xf32> to vector<1x192xf32>
      %88 = vector.broadcast %87 : vector<1x192xf32> to vector<24x192xf32>
      %89 = arith.addf %84, %88 : vector<24x192xf32>
      %90 = arith.index_cast %50 : i32 to index
      %c0_51 = arith.constant 0 : index
      %c0_52 = arith.constant 0 : index
      %91 = vector.load %arg10[%90, %c0_51, %c0_52] : memref<2x64x64xbf16, #tpu.memory_space<vmem>>, vector<1x64x64xbf16>
      %92 = vector.shape_cast %91 : vector<1x64x64xbf16> to vector<64x64xbf16>
      %93 = arith.index_cast %50 : i32 to index
      %c0_53 = arith.constant 0 : index
      %c0_54 = arith.constant 0 : index
      %94 = vector.load %arg11[%93, %c0_53, %c0_54] : memref<2x1x64xf32, #tpu.memory_space<vmem>>, vector<1x1x64xf32>
      %95 = vector.shape_cast %94 : vector<1x1x64xf32> to vector<1x64xf32>
      %96 = vector.extract_strided_slice %89 {offsets = [0, 0], sizes = [24, 16], strides = [1, 1]} : vector<24x192xf32> to vector<24x16xf32>
      %97 = vector.extract_strided_slice %89 {offsets = [0, 64], sizes = [24, 16], strides = [1, 1]} : vector<24x192xf32> to vector<24x16xf32>
      %98 = vector.extract_strided_slice %89 {offsets = [0, 128], sizes = [24, 16], strides = [1, 1]} : vector<24x192xf32> to vector<24x16xf32>
      %99 = arith.truncf %96 : vector<24x16xf32> to vector<24x16xbf16>
      %100 = arith.truncf %97 : vector<24x16xf32> to vector<24x16xbf16>
      %cst_55 = arith.constant dense<0.000000e+00> : vector<24x24xf32>
      %101 = tpu.matmul %99, %100, %cst_55 {dimension_numbers = #tpu.dot_dimension_numbers<[1], [1], [0], [0], [0, 0, 1, 0], [], []>} : vector<24x16xbf16>, vector<24x16xbf16>, vector<24x24xf32> -> vector<24x24xf32>
      %cst_56 = arith.constant 2.500000e-01 : f32
      %102 = vector.broadcast %cst_56 : f32 to vector<24x24xf32>
      %103 = arith.mulf %101, %102 : vector<24x24xf32>
      %cst_57 = arith.constant dense<0xFF800000> : vector<24xf32>
      %104 = vector.multi_reduction <maximumf>, %103, %cst_57 [1] : vector<24x24xf32> to vector<24xf32>
      %105 = vector.shape_cast %104 : vector<24xf32> to vector<24x1xf32>
      %106 = vector.broadcast %105 : vector<24x1xf32> to vector<24x24xf32>
      %107 = arith.subf %103, %106 : vector<24x24xf32>
      %108 = math.exp %107 : vector<24x24xf32>
      %cst_58 = arith.constant dense<0.000000e+00> : vector<24xf32>
      %109 = vector.multi_reduction <add>, %108, %cst_58 [1] : vector<24x24xf32> to vector<24xf32>
      %110 = vector.shape_cast %109 : vector<24xf32> to vector<24x1xf32>
      %111 = tpu.reciprocal %110 {approx = true} : vector<24x1xf32> -> vector<24x1xf32>
      %112 = vector.broadcast %111 : vector<24x1xf32> to vector<24x24xf32>
      %113 = arith.mulf %108, %112 : vector<24x24xf32>
      %114 = arith.truncf %113 : vector<24x24xf32> to vector<24x24xbf16>
      %115 = arith.truncf %98 : vector<24x16xf32> to vector<24x16xbf16>
      %cst_59 = arith.constant dense<0.000000e+00> : vector<24x16xf32>
      %116 = tpu.matmul %114, %115, %cst_59 {dimension_numbers = #tpu.dot_dimension_numbers<[1], [0], [0], [1], [0, 0, 1, 1], [], []>} : vector<24x24xbf16>, vector<24x16xbf16>, vector<24x16xf32> -> vector<24x16xf32>
      %117 = arith.truncf %116 : vector<24x16xf32> to vector<24x16xbf16>
      %118 = vector.extract_strided_slice %92 {offsets = [0, 0], sizes = [16, 64], strides = [1, 1]} : vector<64x64xbf16> to vector<16x64xbf16>
      %cst_60 = arith.constant dense<0.000000e+00> : vector<24x64xf32>
      %119 = tpu.matmul %117, %118, %cst_60 {dimension_numbers = #tpu.dot_dimension_numbers<[1], [0], [0], [1], [0, 0, 1, 1], [], []>} : vector<24x16xbf16>, vector<16x64xbf16>, vector<24x64xf32> -> vector<24x64xf32>
      %120 = vector.broadcast %95 : vector<1x64xf32> to vector<24x64xf32>
      %121 = arith.addf %120, %119 : vector<24x64xf32>
      %122 = vector.extract_strided_slice %89 {offsets = [0, 16], sizes = [24, 16], strides = [1, 1]} : vector<24x192xf32> to vector<24x16xf32>
      %123 = vector.extract_strided_slice %89 {offsets = [0, 80], sizes = [24, 16], strides = [1, 1]} : vector<24x192xf32> to vector<24x16xf32>
      %124 = vector.extract_strided_slice %89 {offsets = [0, 144], sizes = [24, 16], strides = [1, 1]} : vector<24x192xf32> to vector<24x16xf32>
      %125 = arith.truncf %122 : vector<24x16xf32> to vector<24x16xbf16>
      %126 = arith.truncf %123 : vector<24x16xf32> to vector<24x16xbf16>
      %cst_61 = arith.constant dense<0.000000e+00> : vector<24x24xf32>
      %127 = tpu.matmul %125, %126, %cst_61 {dimension_numbers = #tpu.dot_dimension_numbers<[1], [1], [0], [0], [0, 0, 1, 0], [], []>} : vector<24x16xbf16>, vector<24x16xbf16>, vector<24x24xf32> -> vector<24x24xf32>
      %cst_62 = arith.constant 2.500000e-01 : f32
      %128 = vector.broadcast %cst_62 : f32 to vector<24x24xf32>
      %129 = arith.mulf %127, %128 : vector<24x24xf32>
      %cst_63 = arith.constant dense<0xFF800000> : vector<24xf32>
      %130 = vector.multi_reduction <maximumf>, %129, %cst_63 [1] : vector<24x24xf32> to vector<24xf32>
      %131 = vector.shape_cast %130 : vector<24xf32> to vector<24x1xf32>
      %132 = vector.broadcast %131 : vector<24x1xf32> to vector<24x24xf32>
      %133 = arith.subf %129, %132 : vector<24x24xf32>
      %134 = math.exp %133 : vector<24x24xf32>
      %cst_64 = arith.constant dense<0.000000e+00> : vector<24xf32>
      %135 = vector.multi_reduction <add>, %134, %cst_64 [1] : vector<24x24xf32> to vector<24xf32>
      %136 = vector.shape_cast %135 : vector<24xf32> to vector<24x1xf32>
      %137 = tpu.reciprocal %136 {approx = true} : vector<24x1xf32> -> vector<24x1xf32>
      %138 = vector.broadcast %137 : vector<24x1xf32> to vector<24x24xf32>
      %139 = arith.mulf %134, %138 : vector<24x24xf32>
      %140 = arith.truncf %139 : vector<24x24xf32> to vector<24x24xbf16>
      %141 = arith.truncf %124 : vector<24x16xf32> to vector<24x16xbf16>
      %cst_65 = arith.constant dense<0.000000e+00> : vector<24x16xf32>
      %142 = tpu.matmul %140, %141, %cst_65 {dimension_numbers = #tpu.dot_dimension_numbers<[1], [0], [0], [1], [0, 0, 1, 1], [], []>} : vector<24x24xbf16>, vector<24x16xbf16>, vector<24x16xf32> -> vector<24x16xf32>
      %143 = arith.truncf %142 : vector<24x16xf32> to vector<24x16xbf16>
      %144 = vector.extract_strided_slice %92 {offsets = [16, 0], sizes = [16, 64], strides = [1, 1]} : vector<64x64xbf16> to vector<16x64xbf16>
      %cst_66 = arith.constant dense<0.000000e+00> : vector<24x64xf32>
      %145 = tpu.matmul %143, %144, %cst_66 {dimension_numbers = #tpu.dot_dimension_numbers<[1], [0], [0], [1], [0, 0, 1, 1], [], []>} : vector<24x16xbf16>, vector<16x64xbf16>, vector<24x64xf32> -> vector<24x64xf32>
      %146 = arith.addf %121, %145 : vector<24x64xf32>
      %147 = vector.extract_strided_slice %89 {offsets = [0, 32], sizes = [24, 16], strides = [1, 1]} : vector<24x192xf32> to vector<24x16xf32>
      %148 = vector.extract_strided_slice %89 {offsets = [0, 96], sizes = [24, 16], strides = [1, 1]} : vector<24x192xf32> to vector<24x16xf32>
      %149 = vector.extract_strided_slice %89 {offsets = [0, 160], sizes = [24, 16], strides = [1, 1]} : vector<24x192xf32> to vector<24x16xf32>
      %150 = arith.truncf %147 : vector<24x16xf32> to vector<24x16xbf16>
      %151 = arith.truncf %148 : vector<24x16xf32> to vector<24x16xbf16>
      %cst_67 = arith.constant dense<0.000000e+00> : vector<24x24xf32>
      %152 = tpu.matmul %150, %151, %cst_67 {dimension_numbers = #tpu.dot_dimension_numbers<[1], [1], [0], [0], [0, 0, 1, 0], [], []>} : vector<24x16xbf16>, vector<24x16xbf16>, vector<24x24xf32> -> vector<24x24xf32>
      %cst_68 = arith.constant 2.500000e-01 : f32
      %153 = vector.broadcast %cst_68 : f32 to vector<24x24xf32>
      %154 = arith.mulf %152, %153 : vector<24x24xf32>
      %cst_69 = arith.constant dense<0xFF800000> : vector<24xf32>
      %155 = vector.multi_reduction <maximumf>, %154, %cst_69 [1] : vector<24x24xf32> to vector<24xf32>
      %156 = vector.shape_cast %155 : vector<24xf32> to vector<24x1xf32>
      %157 = vector.broadcast %156 : vector<24x1xf32> to vector<24x24xf32>
      %158 = arith.subf %154, %157 : vector<24x24xf32>
      %159 = math.exp %158 : vector<24x24xf32>
      %cst_70 = arith.constant dense<0.000000e+00> : vector<24xf32>
      %160 = vector.multi_reduction <add>, %159, %cst_70 [1] : vector<24x24xf32> to vector<24xf32>
      %161 = vector.shape_cast %160 : vector<24xf32> to vector<24x1xf32>
      %162 = tpu.reciprocal %161 {approx = true} : vector<24x1xf32> -> vector<24x1xf32>
      %163 = vector.broadcast %162 : vector<24x1xf32> to vector<24x24xf32>
      %164 = arith.mulf %159, %163 : vector<24x24xf32>
      %165 = arith.truncf %164 : vector<24x24xf32> to vector<24x24xbf16>
      %166 = arith.truncf %149 : vector<24x16xf32> to vector<24x16xbf16>
      %cst_71 = arith.constant dense<0.000000e+00> : vector<24x16xf32>
      %167 = tpu.matmul %165, %166, %cst_71 {dimension_numbers = #tpu.dot_dimension_numbers<[1], [0], [0], [1], [0, 0, 1, 1], [], []>} : vector<24x24xbf16>, vector<24x16xbf16>, vector<24x16xf32> -> vector<24x16xf32>
      %168 = arith.truncf %167 : vector<24x16xf32> to vector<24x16xbf16>
      %169 = vector.extract_strided_slice %92 {offsets = [32, 0], sizes = [16, 64], strides = [1, 1]} : vector<64x64xbf16> to vector<16x64xbf16>
      %cst_72 = arith.constant dense<0.000000e+00> : vector<24x64xf32>
      %170 = tpu.matmul %168, %169, %cst_72 {dimension_numbers = #tpu.dot_dimension_numbers<[1], [0], [0], [1], [0, 0, 1, 1], [], []>} : vector<24x16xbf16>, vector<16x64xbf16>, vector<24x64xf32> -> vector<24x64xf32>
      %171 = arith.addf %146, %170 : vector<24x64xf32>
      %172 = vector.extract_strided_slice %89 {offsets = [0, 48], sizes = [24, 16], strides = [1, 1]} : vector<24x192xf32> to vector<24x16xf32>
      %173 = vector.extract_strided_slice %89 {offsets = [0, 112], sizes = [24, 16], strides = [1, 1]} : vector<24x192xf32> to vector<24x16xf32>
      %174 = vector.extract_strided_slice %89 {offsets = [0, 176], sizes = [24, 16], strides = [1, 1]} : vector<24x192xf32> to vector<24x16xf32>
      %175 = arith.truncf %172 : vector<24x16xf32> to vector<24x16xbf16>
      %176 = arith.truncf %173 : vector<24x16xf32> to vector<24x16xbf16>
      %cst_73 = arith.constant dense<0.000000e+00> : vector<24x24xf32>
      %177 = tpu.matmul %175, %176, %cst_73 {dimension_numbers = #tpu.dot_dimension_numbers<[1], [1], [0], [0], [0, 0, 1, 0], [], []>} : vector<24x16xbf16>, vector<24x16xbf16>, vector<24x24xf32> -> vector<24x24xf32>
      %cst_74 = arith.constant 2.500000e-01 : f32
      %178 = vector.broadcast %cst_74 : f32 to vector<24x24xf32>
      %179 = arith.mulf %177, %178 : vector<24x24xf32>
      %cst_75 = arith.constant dense<0xFF800000> : vector<24xf32>
      %180 = vector.multi_reduction <maximumf>, %179, %cst_75 [1] : vector<24x24xf32> to vector<24xf32>
      %181 = vector.shape_cast %180 : vector<24xf32> to vector<24x1xf32>
      %182 = vector.broadcast %181 : vector<24x1xf32> to vector<24x24xf32>
      %183 = arith.subf %179, %182 : vector<24x24xf32>
      %184 = math.exp %183 : vector<24x24xf32>
      %cst_76 = arith.constant dense<0.000000e+00> : vector<24xf32>
      %185 = vector.multi_reduction <add>, %184, %cst_76 [1] : vector<24x24xf32> to vector<24xf32>
      %186 = vector.shape_cast %185 : vector<24xf32> to vector<24x1xf32>
      %187 = tpu.reciprocal %186 {approx = true} : vector<24x1xf32> -> vector<24x1xf32>
      %188 = vector.broadcast %187 : vector<24x1xf32> to vector<24x24xf32>
      %189 = arith.mulf %184, %188 : vector<24x24xf32>
      %190 = arith.truncf %189 : vector<24x24xf32> to vector<24x24xbf16>
      %191 = arith.truncf %174 : vector<24x16xf32> to vector<24x16xbf16>
      %cst_77 = arith.constant dense<0.000000e+00> : vector<24x16xf32>
      %192 = tpu.matmul %190, %191, %cst_77 {dimension_numbers = #tpu.dot_dimension_numbers<[1], [0], [0], [1], [0, 0, 1, 1], [], []>} : vector<24x24xbf16>, vector<24x16xbf16>, vector<24x16xf32> -> vector<24x16xf32>
      %193 = arith.truncf %192 : vector<24x16xf32> to vector<24x16xbf16>
      %194 = vector.extract_strided_slice %92 {offsets = [48, 0], sizes = [16, 64], strides = [1, 1]} : vector<64x64xbf16> to vector<16x64xbf16>
      %cst_78 = arith.constant dense<0.000000e+00> : vector<24x64xf32>
      %195 = tpu.matmul %193, %194, %cst_78 {dimension_numbers = #tpu.dot_dimension_numbers<[1], [0], [0], [1], [0, 0, 1, 1], [], []>} : vector<24x16xbf16>, vector<16x64xbf16>, vector<24x64xf32> -> vector<24x64xf32>
      %196 = arith.addf %171, %195 : vector<24x64xf32>
      %197 = arith.addf %51, %196 : vector<24x64xf32>
      %c0_79 = arith.constant 0 : index
      %c0_80 = arith.constant 0 : index
      %198 = vector.load %arg23[%c0_79, %c0_80] : memref<24x64xf32, #tpu.memory_space<vmem>>, vector<24x64xf32>
      tpu.vector_store %arg23[%c0_79, %c0_80], %197 {strides = array<i32>} : memref<24x64xf32, #tpu.memory_space<vmem>>, vector<24x64xf32>,
      %c0_81 = arith.constant 0 : index
      %c0_82 = arith.constant 0 : index
      %199 = vector.load %arg23[%c0_81, %c0_82] : memref<24x64xf32, #tpu.memory_space<vmem>>, vector<24x64xf32>
      %200 = arith.index_cast %50 : i32 to index
      %c0_83 = arith.constant 0 : index
      %c0_84 = arith.constant 0 : index
      %201 = vector.load %arg12[%200, %c0_83, %c0_84] : memref<2x1x64xf32, #tpu.memory_space<vmem>>, vector<1x1x64xf32>
      %202 = vector.shape_cast %201 : vector<1x1x64xf32> to vector<1x64xf32>
      %203 = arith.index_cast %50 : i32 to index
      %c0_85 = arith.constant 0 : index
      %c0_86 = arith.constant 0 : index
      %204 = vector.load %arg13[%203, %c0_85, %c0_86] : memref<2x1x64xf32, #tpu.memory_space<vmem>>, vector<1x1x64xf32>
      %205 = vector.shape_cast %204 : vector<1x1x64xf32> to vector<1x64xf32>
      %cst_87 = arith.constant dense<0.000000e+00> : vector<24xf32>
      %206 = vector.multi_reduction <add>, %199, %cst_87 [1] : vector<24x64xf32> to vector<24xf32>
      %207 = vector.shape_cast %206 : vector<24xf32> to vector<24x1xf32>
      %cst_88 = arith.constant 6.400000e+01 : f32
      %208 = vector.broadcast %cst_88 : f32 to vector<24x1xf32>
      %209 = arith.divf %207, %208 : vector<24x1xf32>
      %210 = vector.broadcast %209 : vector<24x1xf32> to vector<24x64xf32>
      %211 = arith.subf %199, %210 : vector<24x64xf32>
      %212 = arith.mulf %211, %211 : vector<24x64xf32>
      %cst_89 = arith.constant dense<0.000000e+00> : vector<24xf32>
      %213 = vector.multi_reduction <add>, %212, %cst_89 [1] : vector<24x64xf32> to vector<24xf32>
      %214 = vector.shape_cast %213 : vector<24xf32> to vector<24x1xf32>
      %cst_90 = arith.constant 6.400000e+01 : f32
      %215 = vector.broadcast %cst_90 : f32 to vector<24x1xf32>
      %216 = arith.divf %214, %215 : vector<24x1xf32>
      %217 = vector.broadcast %209 : vector<24x1xf32> to vector<24x64xf32>
      %218 = arith.subf %199, %217 : vector<24x64xf32>
      %cst_91 = arith.constant 9.99999974E-6 : f32
      %219 = vector.broadcast %cst_91 : f32 to vector<24x1xf32>
      %220 = arith.addf %216, %219 : vector<24x1xf32>
      %221 = math.rsqrt %220 : vector<24x1xf32>
      %222 = vector.broadcast %221 : vector<24x1xf32> to vector<24x64xf32>
      %223 = arith.mulf %218, %222 : vector<24x64xf32>
      %224 = vector.broadcast %202 : vector<1x64xf32> to vector<24x64xf32>
      %225 = arith.mulf %223, %224 : vector<24x64xf32>
      %226 = vector.broadcast %205 : vector<1x64xf32> to vector<24x64xf32>
      %227 = arith.addf %225, %226 : vector<24x64xf32>
      %228 = arith.truncf %227 : vector<24x64xf32> to vector<24x64xbf16>
      %229 = arith.index_cast %50 : i32 to index
      %c0_92 = arith.constant 0 : index
      %c0_93 = arith.constant 0 : index
      %230 = vector.load %arg14[%229, %c0_92, %c0_93] : memref<2x64x256xbf16, #tpu.memory_space<vmem>>, vector<1x64x256xbf16>
      %231 = vector.shape_cast %230 : vector<1x64x256xbf16> to vector<64x256xbf16>
      %cst_94 = arith.constant dense<0.000000e+00> : vector<24x256xf32>
      %232 = tpu.matmul %228, %231, %cst_94 {dimension_numbers = #tpu.dot_dimension_numbers<[1], [0], [0], [1], [0, 0, 1, 1], [], []>} : vector<24x64xbf16>, vector<64x256xbf16>, vector<24x256xf32> -> vector<24x256xf32>
      %233 = arith.index_cast %50 : i32 to index
      %c0_95 = arith.constant 0 : index
      %c0_96 = arith.constant 0 : index
      %234 = vector.load %arg15[%233, %c0_95, %c0_96] : memref<2x1x256xf32, #tpu.memory_space<vmem>>, vector<1x1x256xf32>
      %235 = vector.shape_cast %234 : vector<1x1x256xf32> to vector<1x256xf32>
      %236 = vector.broadcast %235 : vector<1x256xf32> to vector<24x256xf32>
      %237 = arith.addf %232, %236 : vector<24x256xf32>
      %cst_97 = arith.constant 5.000000e-01 : f32
      %238 = vector.broadcast %cst_97 : f32 to vector<24x256xf32>
      %239 = arith.mulf %238, %237 : vector<24x256xf32>
      %cst_98 = arith.constant 4.471500e-02 : f32
      %240 = vector.broadcast %cst_98 : f32 to vector<24x256xf32>
      %241 = arith.mulf %240, %237 : vector<24x256xf32>
      %242 = arith.mulf %241, %237 : vector<24x256xf32>
      %243 = arith.mulf %242, %237 : vector<24x256xf32>
      %244 = arith.addf %237, %243 : vector<24x256xf32>
      %cst_99 = arith.constant 0.797884583 : f32
      %245 = vector.broadcast %cst_99 : f32 to vector<24x256xf32>
      %246 = arith.mulf %245, %244 : vector<24x256xf32>
      %247 = math.tanh %246 : vector<24x256xf32>
      %cst_100 = arith.constant 1.000000e+00 : f32
      %248 = vector.broadcast %cst_100 : f32 to vector<24x256xf32>
      %249 = arith.addf %248, %247 : vector<24x256xf32>
      %250 = arith.mulf %239, %249 : vector<24x256xf32>
      %251 = arith.truncf %250 : vector<24x256xf32> to vector<24x256xbf16>
      %252 = arith.index_cast %50 : i32 to index
      %c0_101 = arith.constant 0 : index
      %c0_102 = arith.constant 0 : index
      %253 = vector.load %arg16[%252, %c0_101, %c0_102] : memref<2x256x64xbf16, #tpu.memory_space<vmem>>, vector<1x256x64xbf16>
      %254 = vector.shape_cast %253 : vector<1x256x64xbf16> to vector<256x64xbf16>
      %cst_103 = arith.constant dense<0.000000e+00> : vector<24x64xf32>
      %255 = tpu.matmul %251, %254, %cst_103 {dimension_numbers = #tpu.dot_dimension_numbers<[1], [0], [0], [1], [0, 0, 1, 1], [], []>} : vector<24x256xbf16>, vector<256x64xbf16>, vector<24x64xf32> -> vector<24x64xf32>
      %256 = arith.index_cast %50 : i32 to index
      %c0_104 = arith.constant 0 : index
      %c0_105 = arith.constant 0 : index
      %257 = vector.load %arg17[%256, %c0_104, %c0_105] : memref<2x1x64xf32, #tpu.memory_space<vmem>>, vector<1x1x64xf32>
      %258 = vector.shape_cast %257 : vector<1x1x64xf32> to vector<1x64xf32>
      %259 = vector.broadcast %258 : vector<1x64xf32> to vector<24x64xf32>
      %260 = arith.addf %255, %259 : vector<24x64xf32>
      %261 = arith.addf %199, %260 : vector<24x64xf32>
      %c0_106 = arith.constant 0 : index
      %c0_107 = arith.constant 0 : index
      %262 = vector.load %arg23[%c0_106, %c0_107] : memref<24x64xf32, #tpu.memory_space<vmem>>, vector<24x64xf32>
      tpu.vector_store %arg23[%c0_106, %c0_107], %261 {strides = array<i32>} : memref<24x64xf32, #tpu.memory_space<vmem>>, vector<24x64xf32>,
    }
    %c2_i32_13 = arith.constant 2 : i32
    %c0_14 = arith.constant 0 : index
    %c0_15 = arith.constant 0 : index
    %14 = vector.load %arg23[%c0_14, %c0_15] : memref<24x64xf32, #tpu.memory_space<vmem>>, vector<24x64xf32>
    %c0_16 = arith.constant 0 : index
    %c0_17 = arith.constant 0 : index
    %15 = vector.load %arg18[%c0_16, %c0_17] : memref<1x64xf32, #tpu.memory_space<vmem>>, vector<1x64xf32>
    %c0_18 = arith.constant 0 : index
    %c0_19 = arith.constant 0 : index
    %16 = vector.load %arg19[%c0_18, %c0_19] : memref<1x64xf32, #tpu.memory_space<vmem>>, vector<1x64xf32>
    %cst_20 = arith.constant dense<0.000000e+00> : vector<24xf32>
    %17 = vector.multi_reduction <add>, %14, %cst_20 [1] : vector<24x64xf32> to vector<24xf32>
    %18 = vector.shape_cast %17 : vector<24xf32> to vector<24x1xf32>
    %cst_21 = arith.constant 6.400000e+01 : f32
    %19 = vector.broadcast %cst_21 : f32 to vector<24x1xf32>
    %20 = arith.divf %18, %19 : vector<24x1xf32>
    %21 = vector.broadcast %20 : vector<24x1xf32> to vector<24x64xf32>
    %22 = arith.subf %14, %21 : vector<24x64xf32>
    %23 = arith.mulf %22, %22 : vector<24x64xf32>
    %cst_22 = arith.constant dense<0.000000e+00> : vector<24xf32>
    %24 = vector.multi_reduction <add>, %23, %cst_22 [1] : vector<24x64xf32> to vector<24xf32>
    %25 = vector.shape_cast %24 : vector<24xf32> to vector<24x1xf32>
    %cst_23 = arith.constant 6.400000e+01 : f32
    %26 = vector.broadcast %cst_23 : f32 to vector<24x1xf32>
    %27 = arith.divf %25, %26 : vector<24x1xf32>
    %28 = vector.broadcast %20 : vector<24x1xf32> to vector<24x64xf32>
    %29 = arith.subf %14, %28 : vector<24x64xf32>
    %cst_24 = arith.constant 9.99999974E-6 : f32
    %30 = vector.broadcast %cst_24 : f32 to vector<24x1xf32>
    %31 = arith.addf %27, %30 : vector<24x1xf32>
    %32 = math.rsqrt %31 : vector<24x1xf32>
    %33 = vector.broadcast %32 : vector<24x1xf32> to vector<24x64xf32>
    %34 = arith.mulf %29, %33 : vector<24x64xf32>
    %35 = vector.broadcast %15 : vector<1x64xf32> to vector<24x64xf32>
    %36 = arith.mulf %34, %35 : vector<24x64xf32>
    %37 = vector.broadcast %16 : vector<1x64xf32> to vector<24x64xf32>
    %38 = arith.addf %36, %37 : vector<24x64xf32>
    %39 = vector.extract_strided_slice %38 {offsets = [0, 0], sizes = [16, 64], strides = [1, 1]} : vector<24x64xf32> to vector<16x64xf32>
    %40 = arith.truncf %39 : vector<16x64xf32> to vector<16x64xbf16>
    %c0_25 = arith.constant 0 : index
    %c0_26 = arith.constant 0 : index
    %41 = vector.load %arg20[%c0_25, %c0_26] : memref<64x128xbf16, #tpu.memory_space<vmem>>, vector<64x128xbf16>
    %cst_27 = arith.constant dense<0.000000e+00> : vector<16x128xf32>
    %42 = tpu.matmul %40, %41, %cst_27 {dimension_numbers = #tpu.dot_dimension_numbers<[1], [0], [0], [1], [0, 0, 1, 1], [], []>} : vector<16x64xbf16>, vector<64x128xbf16>, vector<16x128xf32> -> vector<16x128xf32>
    %c0_28 = arith.constant 0 : index
    %c0_29 = arith.constant 0 : index
    %43 = vector.load %arg21[%c0_28, %c0_29] : memref<1x128xf32, #tpu.memory_space<vmem>>, vector<1x128xf32>
    %44 = vector.broadcast %43 : vector<1x128xf32> to vector<16x128xf32>
    %45 = arith.addf %42, %44 : vector<16x128xf32>
    %c0_30 = arith.constant 0 : index
    %c0_31 = arith.constant 0 : index
    %c0_32 = arith.constant 0 : index
    %46 = vector.load %arg22[%c0_30, %c0_31, %c0_32] : memref<1x16x128xf32, #tpu.memory_space<vmem>>, vector<1x16x128xf32>
    %47 = vector.shape_cast %46 : vector<1x16x128xf32> to vector<16x128xf32>
    %48 = vector.shape_cast %45 : vector<16x128xf32> to vector<1x16x128xf32>
    tpu.vector_store %arg22[%c0_30, %c0_31, %c0_32], %48 {strides = array<i32>} : memref<1x16x128xf32, #tpu.memory_space<vmem>>, vector<1x16x128xf32>,
    return
  }
  func.func @transform_0(%arg0: i32) -> (i32, i32, i32) {
    %c0_i32 = arith.constant 0 : i32
    %c0_i32_0 = arith.constant 0 : i32
    %c0_i32_1 = arith.constant 0 : i32
    return %arg0, %c0_i32, %c0_i32_0 : i32, i32, i32
  }
  func.func @transform_1(%arg0: i32) -> (i32, i32) {
    %c0_i32 = arith.constant 0 : i32
    %c0_i32_0 = arith.constant 0 : i32
    %c0_i32_1 = arith.constant 0 : i32
    return %c0_i32, %c0_i32_0 : i32, i32
  }
  func.func @transform_2(%arg0: i32) -> (i32, i32) {
    %c0_i32 = arith.constant 0 : i32
    %c0_i32_0 = arith.constant 0 : i32
    %c0_i32_1 = arith.constant 0 : i32
    return %c0_i32, %c0_i32_0 : i32, i32
  }
  func.func @transform_3(%arg0: i32) -> (i32, i32) {
    %c0_i32 = arith.constant 0 : i32
    %c0_i32_0 = arith.constant 0 : i32
    %c0_i32_1 = arith.constant 0 : i32
    return %c0_i32, %c0_i32_0 : i32, i32
  }
  func.func @transform_4(%arg0: i32) -> (i32, i32) {
    %c0_i32 = arith.constant 0 : i32
    %c0_i32_0 = arith.constant 0 : i32
    %c0_i32_1 = arith.constant 0 : i32
    return %c0_i32, %c0_i32_0 : i32, i32
  }
  func.func @transform_5(%arg0: i32) -> (i32, i32, i32) {
    %c0_i32 = arith.constant 0 : i32
    %c0_i32_0 = arith.constant 0 : i32
    %c0_i32_1 = arith.constant 0 : i32
    %c0_i32_2 = arith.constant 0 : i32
    return %c0_i32, %c0_i32_0, %c0_i32_1 : i32, i32, i32
  }
  func.func @transform_6(%arg0: i32) -> (i32, i32, i32) {
    %c0_i32 = arith.constant 0 : i32
    %c0_i32_0 = arith.constant 0 : i32
    %c0_i32_1 = arith.constant 0 : i32
    %c0_i32_2 = arith.constant 0 : i32
    return %c0_i32, %c0_i32_0, %c0_i32_1 : i32, i32, i32
  }
  func.func @transform_7(%arg0: i32) -> (i32, i32, i32) {
    %c0_i32 = arith.constant 0 : i32
    %c0_i32_0 = arith.constant 0 : i32
    %c0_i32_1 = arith.constant 0 : i32
    %c0_i32_2 = arith.constant 0 : i32
    return %c0_i32, %c0_i32_0, %c0_i32_1 : i32, i32, i32
  }
  func.func @transform_8(%arg0: i32) -> (i32, i32, i32) {
    %c0_i32 = arith.constant 0 : i32
    %c0_i32_0 = arith.constant 0 : i32
    %c0_i32_1 = arith.constant 0 : i32
    %c0_i32_2 = arith.constant 0 : i32
    return %c0_i32, %c0_i32_0, %c0_i32_1 : i32, i32, i32
  }
  func.func @transform_9(%arg0: i32) -> (i32, i32, i32) {
    %c0_i32 = arith.constant 0 : i32
    %c0_i32_0 = arith.constant 0 : i32
    %c0_i32_1 = arith.constant 0 : i32
    %c0_i32_2 = arith.constant 0 : i32
    return %c0_i32, %c0_i32_0, %c0_i32_1 : i32, i32, i32
  }
  func.func @transform_10(%arg0: i32) -> (i32, i32, i32) {
    %c0_i32 = arith.constant 0 : i32
    %c0_i32_0 = arith.constant 0 : i32
    %c0_i32_1 = arith.constant 0 : i32
    %c0_i32_2 = arith.constant 0 : i32
    return %c0_i32, %c0_i32_0, %c0_i32_1 : i32, i32, i32
  }
  func.func @transform_11(%arg0: i32) -> (i32, i32, i32) {
    %c0_i32 = arith.constant 0 : i32
    %c0_i32_0 = arith.constant 0 : i32
    %c0_i32_1 = arith.constant 0 : i32
    %c0_i32_2 = arith.constant 0 : i32
    return %c0_i32, %c0_i32_0, %c0_i32_1 : i32, i32, i32
  }
  func.func @transform_12(%arg0: i32) -> (i32, i32, i32) {
    %c0_i32 = arith.constant 0 : i32
    %c0_i32_0 = arith.constant 0 : i32
    %c0_i32_1 = arith.constant 0 : i32
    %c0_i32_2 = arith.constant 0 : i32
    return %c0_i32, %c0_i32_0, %c0_i32_1 : i32, i32, i32
  }
  func.func @transform_13(%arg0: i32) -> (i32, i32, i32) {
    %c0_i32 = arith.constant 0 : i32
    %c0_i32_0 = arith.constant 0 : i32
    %c0_i32_1 = arith.constant 0 : i32
    %c0_i32_2 = arith.constant 0 : i32
    return %c0_i32, %c0_i32_0, %c0_i32_1 : i32, i32, i32
  }
  func.func @transform_14(%arg0: i32) -> (i32, i32, i32) {
    %c0_i32 = arith.constant 0 : i32
    %c0_i32_0 = arith.constant 0 : i32
    %c0_i32_1 = arith.constant 0 : i32
    %c0_i32_2 = arith.constant 0 : i32
    return %c0_i32, %c0_i32_0, %c0_i32_1 : i32, i32, i32
  }
  func.func @transform_15(%arg0: i32) -> (i32, i32, i32) {
    %c0_i32 = arith.constant 0 : i32
    %c0_i32_0 = arith.constant 0 : i32
    %c0_i32_1 = arith.constant 0 : i32
    %c0_i32_2 = arith.constant 0 : i32
    return %c0_i32, %c0_i32_0, %c0_i32_1 : i32, i32, i32
  }
  func.func @transform_16(%arg0: i32) -> (i32, i32, i32) {
    %c0_i32 = arith.constant 0 : i32
    %c0_i32_0 = arith.constant 0 : i32
    %c0_i32_1 = arith.constant 0 : i32
    %c0_i32_2 = arith.constant 0 : i32
    return %c0_i32, %c0_i32_0, %c0_i32_1 : i32, i32, i32
  }
  func.func @transform_17(%arg0: i32) -> (i32, i32) {
    %c0_i32 = arith.constant 0 : i32
    %c0_i32_0 = arith.constant 0 : i32
    %c0_i32_1 = arith.constant 0 : i32
    return %c0_i32, %c0_i32_0 : i32, i32
  }
  func.func @transform_18(%arg0: i32) -> (i32, i32) {
    %c0_i32 = arith.constant 0 : i32
    %c0_i32_0 = arith.constant 0 : i32
    %c0_i32_1 = arith.constant 0 : i32
    return %c0_i32, %c0_i32_0 : i32, i32
  }
  func.func @transform_19(%arg0: i32) -> (i32, i32) {
    %c0_i32 = arith.constant 0 : i32
    %c0_i32_0 = arith.constant 0 : i32
    %c0_i32_1 = arith.constant 0 : i32
    return %c0_i32, %c0_i32_0 : i32, i32
  }
  func.func @transform_20(%arg0: i32) -> (i32, i32) {
    %c0_i32 = arith.constant 0 : i32
    %c0_i32_0 = arith.constant 0 : i32
    %c0_i32_1 = arith.constant 0 : i32
    return %c0_i32, %c0_i32_0 : i32, i32
  }
  func.func @transform_21(%arg0: i32) -> (i32, i32, i32) {
    %c0_i32 = arith.constant 0 : i32
    %c0_i32_0 = arith.constant 0 : i32
    %c0_i32_1 = arith.constant 0 : i32
    return %arg0, %c0_i32, %c0_i32_0 : i32, i32, i32
  }
}

</mosaic_0001>

<bundles_post_ra>
// kernel: titok_decoder_forward.1
= control target key start
LH: loop header
LB: loop body
LE: loop exit
PB: predicated region body
PF: predicated region fallthrough
CT: control target
= control target key end

     0   :  { %s3666_s0 = inlined_call_operand.vmem [shape: f32[2,8,16], index: 0, kind: input, shape index: {}]   ;;  %s3667_s1 = inlined_call_operand.vmem [shape: bf16[16,64], index: 1, kind: input, shape index: {}]   ;;  %s3668_s2 = inlined_call_operand.vmem [shape: f32[1,64], index: 2, kind: input, shape index: {}, may-alias: {2,18}]   ;;  %s3669_s3 = inlined_call_operand.vmem [shape: f32[8,64], index: 3, kind: input, shape index: {}]   ;;  %s3670_s4 = inlined_call_operand.vmem [shape: f32[16,64], index: 4, kind: input, shape index: {}]   ;;  %s3671_s5 = inlined_call_operand.vmem [shape: f32[2,1,64], index: 5, kind: input, shape index: {}, may-alias: {5,11}]   ;;  %s3672_s6 = inlined_call_operand.vmem [shape: f32[2,1,64], index: 6, kind: input, shape index: {}, may-alias: {6,10,12,16}]   ;;  %s3673_s7 = inlined_call_operand.vmem [shape: bf16[2,64,192], index: 7, kind: input, shape index: {}]   ;;  %s3674_s8 = inlined_call_operand.vmem [shape: f32[2,1,192], index: 8, kind: input, shape index: {}]   ;;  %s3675_s9 = inlined_call_operand.vmem [shape: bf16[2,64,64], index: 9, kind: input, shape index: {}]   ;;  %s3676_s10 = inlined_call_operand.vmem [shape: f32[2,1,64], index: 10, kind: input, shape index: {}, may-alias: {6,10,12,16}]   ;;  %s3677_s11 = inlined_call_operand.vmem [shape: f32[2,1,64], index: 11, kind: input, shape index: {}, may-alias: {5,11}]   ;;  %s3678_s12 = inlined_call_operand.vmem [shape: f32[2,1,64], index: 12, kind: input, shape index: {}, may-alias: {6,10,12,16}]   ;;  %s3679_s13 = inlined_call_operand.vmem [shape: bf16[2,64,256], index: 13, kind: input, shape index: {}]   ;;  %s3680_s14 = inlined_call_operand.vmem [shape: f32[2,1,256], index: 14, kind: input, shape index: {}]   ;;  %s3681_s15 = inlined_call_operand.vmem [shape: bf16[2,256,64], index: 15, kind: input, shape index: {}]   ;;  %s3682_s16 = inlined_call_operand.vmem [shape: f32[2,1,64], index: 16, kind: input, shape index: {}, may-alias: {6,10,12,16}]   ;;  %s3683_s17 = inlined_call_operand.vmem [shape: f32[1,64], index: 17, kind: input, shape index: {}]   ;;  %s3684_s18 = inlined_call_operand.vmem [shape: f32[1,64], index: 18, kind: input, shape index: {}, may-alias: {2,18}]   ;;  %s3685_s19 = inlined_call_operand.vmem [shape: bf16[64,128], index: 19, kind: input, shape index: {}]   ;;  %s3686_s20 = inlined_call_operand.vmem [shape: f32[1,128], index: 20, kind: input, shape index: {}]   ;;  %s3687_s21 = inlined_call_operand.hbm [shape: f32[2,16,128], index: 21, kind: output, shape index: {}]  }
   0x1   :  { %3699 = sst [smem:[#allocation12_spill]] %s3666_s0 }
   0x2   :  { %3700 = sst [smem:[#allocation13_spill]] %s3667_s1 }
   0x3   :  { %3701 = sst [smem:[#allocation14_spill]] %s3668_s2 }
   0x4   :  { %3702 = sst [smem:[#allocation15_spill]] %s3669_s3 }
   0x5   :  { %3703 = sst [smem:[#allocation16_spill]] %s3670_s4 }
   0x6   :  { %3704 = sst [smem:[#allocation17_spill]] %s3671_s5 }
   0x7   :  { %26 = vsyncpa [#allocation4], 0 }
   0x8   :  { %28 = vsyncpa [#allocation4 + $0x1], 0  ;;  %s3228_s2 = smov 0   ;;  %s3230_s25 = smov 0  }
   0x9   :  { %s3232_s26 = smov 0   ;;  %s3234_s27 = smov 0  }
   0xa LB: > { %3705 = sst [smem:[#allocation6_spill]] %s3087_s2  ;;  %s3249_s3 = sadd.s32 4294967295, %s3099_s27   ;;  %s3099_s27 = sphi %s3234_s27, %s3725_s27   ;;  %s3095_s26 = sphi %s3232_s26, %s3727_s26   ;;  %s3091_s25 = sphi %s3230_s25, %s3729_s25   ;;  %s3087_s2 = sphi %s3228_s2, %s3728_s2  }
   0xb   : > { %3706 = sst [smem:[#allocation7_spill]] %s3095_s26  ;;  %s2544_s28 = sadd.s32 4294967294, %s3099_s27  }
   0xc   : > { %3707 = sst [smem:[#allocation8_spill]] %s3099_s27  ;;  %s3253_s29 = sadd.s32 1, %s3099_s27  }
   0xd   : > { %3708 = sst [smem:[#allocation9_spill]] %s3253_s29  ;;  %s487_s0 = sadd.s32 1, %s3095_s26 }
   0xe   : > { %s484_s4 = ssub.s32 %s3099_s27, %s3253_s29  ;;  %p497_p0 = scmp.ne.s32.totalorder %s3095_s26, %s3091_s25 }
   0xf   : > { %p485_p1 = scmp.eq.s32.totalorder %s484_s4, 0  ;;  %p498_p2 = scmp.eq.s32.totalorder %s3249_s3, 1 }
  0x10   : > { %p503_p3 = scmp.ne.s32.totalorder %s3091_s25, %s3087_s2  ;;  %p504_p4 = scmp.eq.s32.totalorder %s2544_s28, 1 }
  0x11   : > { %s3264_s30 = scalar_select %p485_p1, %s3095_s26, %s487_s0  }
  0x12   : > { %p3266_p5 = por %p498_p2, %p497_p0  ;;  %p3270_p6 = por %p504_p4, %p503_p3 }
  0x13   : > { %3709 = sst [smem:[#allocation10_spill]] %s3264_s30  ;;  %p2547_p7 = scmp.ge.s32.totalorder %s3099_s27, 1 }
  0x14   : > { %s3711_s22 = scalar_select %p3270_p6, 1, 0 }
  0x15   : > { %p589_p8 = scmp.lt.s32.totalorder %s3099_s27, 3 }
  0x16   : > { %3712 = sst [smem:[#allocation11_spill]] %s3711_s22 }
  0x17   : > { %p590_p9 = pnand %p2547_p7, %p589_p8 }
  0x18   : > { %s3694_s23 = sand.u32 (!%p590_p9), 1, %s3091_s25   ;;  %v3105_v0 = vmov (!%p590_p9), 0.0   ;;  %s3713_s0 = sld [smem:[#allocation13_spill]] (!%p590_p9)  ;;  %vm3106_vm0 = vmmov (!%p590_p9), 0   ;;  %vm670_vm1 = vcmask (!%p590_p9), 130048   ;;  %vm718_vm2 = vcmask (!%p590_p9), 523264  }
  0x19   : > { %593 = sbr.rel (%p590_p9) target bundleno = 4012 (0xfac), region = 104  ;;  %s2548_s1 = sshll.u32 (!%p590_p9), %s3694_s23, 4  ;;  %2728 = vmatprep.subr.bf16.mxu0 (!%p590_p9), %v3105_v0  ;;  %2730 = vmatprep.mubr.msk.bf16.mxu0 (!%p590_p9), %vm3106_vm0, %v3105_v0 }
  0x1a   : > { %p648_p10 = scmp.lt.s32.totalorder (!%p590_p9), %s3249_s3, 1  ;;  %s3714_s22 = sld [smem:[#allocation12_spill]] (!%p590_p9) }
  0x1b   : > { %s3715_s28 = sld [smem:[#allocation16_spill]] (!%p590_p9)  ;;  %s3306_s27 = scalar_lea.vmem (!%p590_p9), [#allocation3], %s2548_s1 }
  0x1c   : > { %s3308_s23 = smov (!%p590_p9), 0  }
  0x1e   : > { %v2905_v1 = vld [vmem:[%s3713_s0] sm:$0xff] (!%p590_p9)  }
  0x1f   : > { %2729 = vmatpush3.bf16.msra.mxu0 (!%p590_p9), %v2905_v1 }
  0x20   : > { %s649_s4 = scalar_select %p648_p10, %s3249_s3, 1 }
  0x21   : > { %v716_v4 = vld [vmem:[%s3715_s28] sm:$0xff]  ;;  %v717_v5 = vld [vmem:[%s3715_s28 + $0x8] sm:$0xff] }
  0x22   : > { %s2549_s30 = sshll.u32 %s649_s4, 3  ;;  %719 = vst.msk [vmem:[#allocation2] sm:$0xff] %vm718_vm2, %v716_v4  ;;  %720 = vst.msk [vmem:[#allocation2 + $0x8] sm:$0xff] %vm718_vm2, %v717_v5  ;;  %s3717_s4 = sld [smem:[#allocation15_spill]] }
  0x23   : > { %s651_s2 = scalar_lea.vmem %s3714_s22, %s2549_s30 }
  0x24   : > { %v653_v2 = vld [vmem:[%s651_s2] sm:$0xff]  ;;  %s3716_s2 = sld [smem:[#allocation14_spill]] }
  0x25   : > { %v654_v3 = vpack.c.bf16 %v653_v2, %v653_v2 }
  0x27   : > { %2731 = vmatmul.mubr.msk.bf16.vlgmr.msra.gmra.mrb[0].mxu0 %vm670_vm1, %v654_v3 }
  0x28   : > { %v714_v8 = vld [vmem:[%s3717_s4] sm:$0xff] }
  0x2a   : > { %v2550_v6 = vld [vmem:[%s3716_s2] ss:$0 sm:$0xff] }
  0xfa   : > { %v708_v7 = vpop.f32.mrb[0].mxu0 }
  0xfb   : > { %v709_v9 = vadd.f32 %v2550_v6, %v708_v7  ;;  %v2732_v10 = vpop.f32.mrb[1].mxu0 }
  0xfc   : > { %v711_v11 = vpop.f32.mrb[2].mxu0 }
  0xfd   : > { %v715_v12 = vadd.f32 %v714_v8, %v709_v9  ;;  %v2733_v13 = vpop.f32.mrb[3].mxu0 }
  0xff   : > { %721 = vst.msk [vmem:[#allocation2 + $0x10] sm:$0xff] %vm718_vm2, %v715_v12 }
 0x100 LB: >> { %v728_v14 = vld [vmem:[#allocation2] sm:$0xff]  ;;  %v729_v16 = vld [vmem:[#allocation2 + $0x8] sm:$0xff]  ;;  %s2644_s1 = sshll.u32 %s3103_s23, 6  ;;  %v3107_v36 = vmov 0   ;;  %s2647_s29 = sshll.u32 %s3103_s23, 7  ;;  %v810_v6 = vlaneseq  ;;  %vm1045_vm3 = vcmask 1043456   ;;  %s3103_s23 = sphi %s3308_s23, %s727_s23  }
 0x101   : >> { %v735_v17 = vsel %vm718_vm2, %v728_v14, 0.0  ;;  %v738_v19 = vsel %vm718_vm2, %v729_v16, 0.0  ;;  %s797_s26 = scalar_lea.vmem %s3673_s7, %s2644_s1  ;;  %898 = vmatprep.mubr.bf16.mxu1 %v3107_v36  ;;  %s3328_s22 = scalar_lea.vmem %s3679_s13, %s2644_s1  ;;  %vm1001_vm4 = vcmask 195584  }
 0x102   : >> { %736 = vadd.xlane.f32.xlu0 %v735_v17  ;;  %v2906_v35 = vld [vmem:[%s797_s26 + $0x4] ss:$8 sps:$4 sm:$0xff]   ;;  %v2908_v37 = vld [vmem:[%s797_s26] ss:$8 sps:$4 sm:$0xff]   ;;  %v2909_v38 = vld [vmem:[%s797_s26 + $0x14] ss:$8 sps:$4 sm:$0xff]   ;;  %s3333_s0 = scalar_lea.vmem %s3681_s15, %s2647_s29  ;;  %s733_s24 = scalar_lea.vmem %s3672_s6, %s3103_s23 }
 0x103   : >> { %866 = vmatprep.subr.bf16.mxu1 %v2906_v35  ;;  %v2911_v39 = vld [vmem:[%s797_s26 + $0x10] ss:$8 sps:$4 sm:$0xff]   ;;  %v2912_v40 = vld [vmem:[%s797_s26 + $0x24] ss:$8 sps:$4 sm:$0xff]   ;;  %v2914_v41 = vld [vmem:[%s797_s26 + $0x20] ss:$8 sps:$4 sm:$0xff]  }
 0x104   : >> { %867 = vmatpush1.bf16.msra.mxu1 %v2908_v37  ;;  %v2915_v42 = vld [vmem:[%s797_s26 + $0x34] ss:$8 sps:$4 sm:$0xff]   ;;  %v2917_v43 = vld [vmem:[%s797_s26 + $0x30] ss:$8 sps:$4 sm:$0xff]   ;;  %s3718_s29 = sld [smem:[#allocation17_spill]]  ;;  %s3696_s1 = sshll.u32 %s3103_s23, 1 }
 0x105   : >> { %868 = vmatprep.subr.bf16.mxu1 %v2909_v38  ;;  %v2554_v60 = vld [vmem:[%s733_s24] ss:$0 sm:$0xff]  ;;  %v3347_v7 = vshrl.u32 %v810_v6, 7  ;;  %s3108_s30 = smov 64   ;;  %s3109_s4 = smov 112  }
 0x106   : >> { %v730_v15 = vld [vmem:[#allocation2 + $0x10] sm:$0xff]  ;;  %739 = vadd.xlane.f32.xlu0 %v738_v19  ;;  %s3110_s24 = smov 48   ;;  %s3111_s26 = smov 32  }
 0x107   : >> { %v741_v18 = vsel %vm718_vm2, %v730_v15, 0.0  ;;  %v812_v8 = vsub.s32 0, %v3347_v7  ;;  %v816_v10 = vsub.s32 1, %v3347_v7 }
 0x108   : >> { %742 = vadd.xlane.f32.xlu1 %v741_v18  ;;  %869 = vmatpush1.bf16.msra.mxu1 %v2911_v39 }
 0x109   : >> { %870 = vmatprep.subr.bf16.mxu1 %v2912_v40 }
 0x10a   : >> { %s731_s2 = scalar_lea.vmem %s3718_s29, %s3103_s23  ;;  %s3697_s29 = smov 96  }
 0x10b   : >> { %v2553_v55 = vld [vmem:[%s731_s2] ss:$0 sm:$0xff]  ;;  %s807_s2 = scalar_lea.vmem %s3674_s8, %s3696_s1  ;;  %s3113_s1 = smov 16  }
 0x10c   : >> { %871 = vmatpush1.bf16.msra.mxu1 %v2914_v41  ;;  %v808_v9 = vld [vmem:[%s807_s2] sm:$0x3]  ;;  %s2645_s2 = sshll.u32 %s3103_s23, 5 }
 0x10d   : >> { %872 = vmatprep.subr.bf16.mxu1 %v2915_v42  ;;  %v813_v11 = vrot.slane %v808_v9, %v812_v8  ;;  %v817_v13 = vrot.slane %v808_v9, %v816_v10 }
 0x110   : >> { %873 = vmatpush1.bf16.msra.mxu1 %v2917_v43 }
 0x18f   : >> { %v737_v20 = vpop.xlane.xlu0 %736 }
 0x190   : >> { %v745_v22 = vmul.f32 0.015625, %v737_v20 }
 0x192   : >> { %v748_v24 = vsub.f32 %v728_v14, %v745_v22 }
 0x193   : >> { %v740_v26 = vpop.xlane.xlu0 %739 }
 0x194   : >> { %v746_v27 = vmul.f32 0.015625, %v740_v26  ;;  %v751_v28 = vmul.f32 %v748_v24, %v748_v24 }
 0x195   : >> { %v743_v21 = vpop.xlane.xlu1 %742 }
 0x196   : >> { %v747_v23 = vmul.f32 0.015625, %v743_v21  ;;  %v749_v30 = vsub.f32 %v729_v16, %v746_v27  ;;  %v754_v31 = vsel %vm718_vm2, %v751_v28, 0.0 }
 0x197   : >> { %755 = vadd.xlane.f32.xlu1 %v754_v31 }
 0x198   : >> { %v750_v25 = vsub.f32 %v730_v15, %v747_v23  ;;  %v752_v33 = vmul.f32 %v749_v30, %v749_v30 }
 0x19a   : >> { %v753_v29 = vmul.f32 %v750_v25, %v750_v25  ;;  %v757_v34 = vsel %vm718_vm2, %v752_v33, 0.0 }
 0x19b   : >> { %758 = vadd.xlane.f32.xlu0 %v757_v34 }
 0x19c   : >> { %v760_v32 = vsel %vm718_vm2, %v753_v29, 0.0 }
 0x19d   : >> { %761 = vadd.xlane.f32.xlu1 %v760_v32 }
 0x224   : >> { %v756_v44 = vpop.xlane.xlu1 %755 }
 0x225   : >> { %v763_v45 = vmul.f32 0.015625, %v756_v44 }
 0x227   : >> { %v766_v46 = vadd.f32 1e-05, %v763_v45 }
 0x228   : >> { %v759_v48 = vpop.xlane.xlu0 %758 }
 0x229   : >> { %2950 = vrsqrt.f32 %v766_v46  ;;  %v764_v50 = vmul.f32 0.015625, %v759_v48 }
 0x22a   : >> { %v762_v47 = vpop.xlane.xlu1 %761 }
 0x22b   : >> { %v765_v49 = vmul.f32 0.015625, %v762_v47  ;;  %v767_v52 = vadd.f32 1e-05, %v764_v50 }
 0x22d   : >> { %v768_v51 = vadd.f32 1e-05, %v765_v49 }
 0x22f   : >> { %2952 = vrsqrt.f32 %v768_v51 }
 0x230   : >> { %2954 = vrsqrt.f32 %v767_v52 }
 0x233   : >> { %v2951_v53 = vpop.eup %2950 }
 0x234   : >> { %v772_v54 = vmul.f32 %v2951_v53, %v748_v24 }
 0x236   : >> { %v781_v59 = vmul.f32 %v2553_v55, %v772_v54 }
 0x238   : >> { %v790_v63 = vadd.f32 %v2554_v60, %v781_v59 }
 0x239   : >> { %v2953_v56 = vpop.eup %2952 }
 0x23a   : >> { %v2955_v57 = vpop.eup %2954  ;;  %v774_v62 = vmul.f32 %v2953_v56, %v750_v25 }
 0x23b   : >> { %v773_v58 = vmul.f32 %v2955_v57, %v749_v30 }
 0x23c   : >> { %v783_v3 = vmul.f32 %v2553_v55, %v774_v62 }
 0x23d   : >> { %v782_v61 = vmul.f32 %v2553_v55, %v773_v58 }
 0x23e   : >> { %v792_v4 = vadd.f32 %v2554_v60, %v783_v3 }
 0x23f   : >> { %v791_v1 = vadd.f32 %v2554_v60, %v782_v61 }
 0x240   : >> { %v794_v5 = vpack.c.bf16 %v792_v4, %v792_v4 }
 0x241   : >> { %v793_v2 = vpack.c.bf16 %v791_v1, %v790_v63 }
 0x243   : >> { %2566 = vmatmul.mubr.msk.bf16.vlgmr.msra.gmra.mrb[0].mxu1 %vm718_vm2, %v793_v2 }
 0x244   : >> { %908 = vmatprep.mubr.bf16.mxu1 %v3107_v36 }
 0x24b   : >> { %2567 = vmatmul.mubr.msk.bf16.gmra.mrb[4].mxu1 %vm718_vm2, %v794_v5 }
 0x316   : >> { %v900_v12 = vpop.f32.mrb[0].mxu1 }
 0x317   : >> { %v902_v14 = vpop.f32.mrb[1].mxu1  ;;  %v901_v16 = vadd.f32 %v900_v12, %v813_v11 }
 0x318   : >> { %v904_v15 = vpop.f32.mrb[2].mxu1  ;;  %v903_v19 = vadd.f32 %v902_v14, %v817_v13 }
 0x319   : >> { %v905_v17 = vadd.f32 %v904_v15, %v813_v11  ;;  %v906_v18 = vpop.f32.mrb[3].mxu1 }
 0x31a   : >> { %v907_v20 = vadd.f32 %v906_v18, %v817_v13 }
 0x31b   : >> { %v3360_v21 = vpack.c.bf16 %v905_v17, %v901_v16 }
 0x31c   : >> { %v3362_v22 = vpack.c.bf16 %v907_v20, %v903_v19 }
 0x31d   : >> { %934 = vrot.lane.b32.xlu0 %v3360_v21, %s3108_s30  ;;  %2738 = vmatprep.mubr.msk.bf16.mxu1 %vm670_vm1, %v3360_v21 }
 0x31e   : >> { %v910_v23 = vpop.f32.mrb[4].mxu1  ;;  %2742 = vmatprep.subr.bf16.mxu0 %v3362_v22 }
 0x31f   : >> { %v911_v24 = vadd.f32 %v910_v23, %v813_v11  ;;  %v912_v25 = vpop.f32.mrb[5].mxu1  ;;  %2743 = vmatpush3.bf16.msra.mxu0 %v3362_v22 }
 0x320   : >> { %v913_v26 = vadd.f32 %v912_v25, %v817_v13  ;;  %v914_v27 = vpop.f32.mrb[6].mxu1 }
 0x321   : >> { %v3369_v28 = vpack.c.bf16 %v911_v24, %v911_v24  ;;  %v915_v29 = vpop.f32.mrb[7].mxu1  ;;  %1168 = vrot.lane.b32.xlu0 %v3360_v21, %s3109_s4 }
 0x322   : >> { %v3373_v30 = vpack.c.bf16 %v913_v26, %v913_v26 }
 0x323   : >> { %936 = vrot.lane.b32.xlu1 %v3369_v28, %s3108_s30  ;;  %s928_s30 = scalar_lea.vmem %s3676_s10, %s3103_s23 }
 0x324   : >> { %2836 = vmatprep.subr.msk.bf16.mxu0 %vm1045_vm3, %v3373_v30  ;;  %v1047_v31 = vsel %vm1045_vm3, %v3373_v30, 0 }
 0x325   : >> { %2745 = vmatpush3.bf16.msra.mxu0 %v1047_v31 }
 0x327   : >> { %1172 = vrot.lane.b32.xlu1 %v3360_v21, %s3110_s24 }
 0x32b   : >> { %1174 = vrot.lane.b32.xlu1 %v3369_v28, %s3110_s24 }
 0x32f   : >> { %1170 = vrot.lane.b32.xlu1 %v3369_v28, %s3109_s4 }
 0x38f   : >> { %v935_v32 = vpop.permute.xlu0 %934 }
 0x390   : >> { %v945_v33 = vsel %vm670_vm1, %v935_v32, 0  ;;  %2834 = vmatprep.subr.msk.bf16.mxu1 %vm670_vm1, %v935_v32 }
 0x391   : >> { %2735 = vmatpush3.bf16.xpose.msra.mxu1 %v945_v33 }
 0x393   : >> { %v1169_v38 = vpop.permute.xlu0 %1168 }
 0x395   : >> { %v937_v34 = vpop.permute.xlu1 %936 }
 0x396   : >> { %2835 = vmatprep.subr.msk.bf16.mxu1 %vm670_vm1, %v937_v34  ;;  %v948_v35 = vsel %vm670_vm1, %v937_v34, 0 }
 0x399   : >> { %v1173_v37 = vpop.permute.xlu1 %1172  ;;  %2737 = vmatpush3.bf16.xpose.msra.mxu1 %v948_v35 }
 0x39a   : >> { %2837 = vmatprep.subr.msk.bf16.mxu1 %vm670_vm1, %v1173_v37  ;;  %v1183_v39 = vsel %vm670_vm1, %v1173_v37, 0 }
 0x39d   : >> { %v1175_v40 = vpop.permute.xlu1 %1174 }
 0x39e   : >> { %v1186_v41 = vsel %vm670_vm1, %v1175_v40, 0 }
 0x3a0   : >> { %2739 = vmatmul.mubr.msk.bf16.vlgmr.msra.gmra.mrb[8].mxu1 %vm670_vm1, %v3369_v28 }
 0x3a1   : >> { %2757 = vmatpush3.bf16.xpose.msra.mxu1 %v1183_v39  ;;  %2760 = vmatprep.mubr.msk.bf16.mxu1 %vm670_vm1, %v1169_v38  ;;  %v1171_v42 = vpop.permute.xlu1 %1170 }
 0x3a2   : >> { %2838 = vmatprep.subr.msk.bf16.mxu1 %vm670_vm1, %v1175_v40 }
 0x3a9   : >> { %2759 = vmatpush3.bf16.xpose.msra.mxu1 %v1186_v41 }
 0x3b0   : >> { %2761 = vmatmul.mubr.msk.bf16.vlgmr.msra.gmra.mrb[12].mxu1 %vm670_vm1, %v1171_v42 }
 0x473   : >> { %v2740_v43 = vpop.f32.mrb[8].mxu1 }
 0x474   : >> { %v984_v44 = vpop.f32.mrb[9].mxu1  ;;  %v1000_v48 = vmul.f32 0.25, %v2740_v43 }
 0x475   : >> { %v998_v45 = vmul.f32 0.25, %v984_v44  ;;  %v2741_v46 = vpop.f32.mrb[10].mxu1 }
 0x476   : >> { %v987_v47 = vpop.f32.mrb[11].mxu1  ;;  %v1008_v52 = vsel %vm1001_vm4, %v1000_v48, -inf }
 0x477   : >> { %v999_v49 = vmul.f32 0.25, %v987_v47  ;;  %v1002_v50 = vsel %vm1001_vm4, %v998_v45, -inf }
 0x478   : >> { %1003 = vmax.xlane.f32.xlu0 %v1002_v50 }
 0x479   : >> { %v1005_v51 = vsel %vm1001_vm4, %v999_v49, -inf }
 0x47a   : >> { %1006 = vmax.xlane.f32.xlu1 %v1005_v51 }
 0x47c   : >> { %1009 = vmax.xlane.f32.xlu0 %v1008_v52 }
 0x483   : >> { %v2762_v53 = vpop.f32.mrb[12].mxu1 }
 0x484   : >> { %v1222_v54 = vpop.f32.mrb[13].mxu1  ;;  %v1238_v13 = vmul.f32 0.25, %v2762_v53 }
 0x485   : >> { %v2763_v55 = vpop.f32.mrb[14].mxu1  ;;  %v1236_v12 = vmul.f32 0.25, %v1222_v54 }
 0x486   : >> { %v1225_v56 = vpop.f32.mrb[15].mxu1  ;;  %v1245_v16 = vsel %vm1001_vm4, %v1238_v13, -inf }
 0x487   : >> { %v1239_v14 = vsel %vm1001_vm4, %v1236_v12, -inf  ;;  %v1237_v15 = vmul.f32 0.25, %v1225_v56 }
 0x489   : >> { %v1242_v17 = vsel %vm1001_vm4, %v1237_v15, -inf }
 0x505   : >> { %v1004_v57 = vpop.xlane.xlu0 %1003 }
 0x506   : >> { %v1011_v58 = vsub.f32 %v998_v45, %v1004_v57 }
 0x507   : >> { %v1007_v59 = vpop.xlane.xlu1 %1006 }
 0x508   : >> { %v1014_v60 = vmul.f32 1.442695, %v1011_v58  ;;  %v1012_v61 = vsub.f32 %v999_v49, %v1007_v59 }
 0x509   : >> { %v1010_v62 = vpop.xlane.xlu0 %1009 }
 0x50a   : >> { %2956 = vpow2.f32 %v1014_v60  ;;  %v1016_v63 = vmul.f32 1.442695, %v1012_v61  ;;  %v1013_v1 = vsub.f32 %v1000_v48, %v1010_v62 }
 0x50c   : >> { %2958 = vpow2.f32 %v1016_v63  ;;  %v1018_v2 = vmul.f32 1.442695, %v1013_v1 }
 0x50e   : >> { %2960 = vpow2.f32 %v1018_v2 }
 0x514   : >> { %v2957_v3 = vpop.eup %2956 }
 0x515   : >> { %v1020_v4 = vsel %vm1001_vm4, %v2957_v3, 0.0 }
 0x516   : >> { %v2959_v5 = vpop.eup %2958  ;;  %1021 = vadd.xlane.f32.xlu0 %v1020_v4 }
 0x517   : >> { %v1023_v11 = vsel %vm1001_vm4, %v2959_v5, 0.0 }
 0x518   : >> { %v2961_v6 = vpop.eup %2960 }
 0x519   : >> { %v1026_v9 = vsel %vm1001_vm4, %v2961_v6, 0.0 }
 0x51a   : >> { %1027 = vadd.xlane.f32.xlu1 %v1026_v9  ;;  %1024 = vadd.xlane.f32.xlu0 %v1023_v11 }
 0x52b   : >> { %1409 = vrot.lane.b32.xlu1 %v3369_v28, %s3111_s26 }
 0x52f   : >> { %1403 = vrot.lane.b32.xlu1 %v3360_v21, %s3697_s29 }
 0x530   : >> { %1407 = vrot.lane.b32.xlu0 %v3360_v21, %s3111_s26  ;;  %s3428_s26 = scalar_lea.vmem %s3675_s9, %s2645_s2  ;;  %s3720_s2 = sshll.u32 %s3103_s23, 1 }
 0x531   : >> { %v2918_v55 = vld [vmem:[%s3428_s26] sm:$0xff]   ;;  %s1951_s24 = scalar_lea.vmem %s3680_s14, %s3720_s2 }
 0x532   : >> { %2750 = vmatprep.subr.bf16.mxu0 %v2918_v55 }
 0x533   : >> { %1405 = vrot.lane.b32.xlu1 %v3369_v28, %s3697_s29  ;;  %s3114_s29 = smov 80  }
 0x54f   : >> { %1240 = vmax.xlane.f32.xlu0 %v1239_v14 }
 0x553   : >> { %1246 = vmax.xlane.f32.xlu0 %v1245_v16 }
 0x557   : >> { %1243 = vmax.xlane.f32.xlu1 %v1242_v17 }
 0x5a3   : >> { %v1022_v18 = vpop.xlane.xlu0 %1021 }
 0x5a4   : >> { %2962 = vrcp.f32 %v1022_v18 }
 0x5a7   : >> { %v1025_v19 = vpop.xlane.xlu0 %1024  ;;  %v1028_v20 = vpop.xlane.xlu1 %1027 }
 0x5a8   : >> { %2964 = vrcp.f32 %v1025_v19 }
 0x5a9   : >> { %2966 = vrcp.f32 %v1028_v20 }
 0x5ab   : >> { %v1408_v23 = vpop.permute.xlu0 %1407  ;;  %v1410_v24 = vpop.permute.xlu1 %1409 }
 0x5ac   : >> { %v1418_v25 = vsel %vm670_vm1, %v1408_v23, 0  ;;  %2840 = vmatprep.subr.msk.bf16.mxu1 %vm670_vm1, %v1408_v23  ;;  %v1421_v34 = vsel %vm670_vm1, %v1410_v24, 0 }
 0x5ad   : >> { %2779 = vmatpush3.bf16.xpose.msra.mxu1 %v1418_v25 }
 0x5ae   : >> { %2841 = vmatprep.subr.msk.bf16.mxu1 %vm670_vm1, %v1410_v24  ;;  %v2963_v27 = vpop.eup %2962 }
 0x5af   : >> { %v1404_v26 = vpop.permute.xlu1 %1403  ;;  %v1032_v32 = vmul.f32 %v2963_v27, %v2957_v3 }
 0x5b0   : >> { %2782 = vmatprep.mubr.msk.bf16.mxu1 %vm670_vm1, %v1404_v26 }
 0x5b2   : >> { %v2965_v29 = vpop.eup %2964 }
 0x5b3   : >> { %v2967_v31 = vpop.eup %2966  ;;  %v1033_v33 = vmul.f32 %v2965_v29, %v2959_v5  ;;  %v1406_v39 = vpop.permute.xlu1 %1405 }
 0x5b4   : >> { %v1034_v35 = vmul.f32 %v2967_v31, %v2961_v6 }
 0x5b5   : >> { %2781 = vmatpush3.bf16.xpose.msra.mxu1 %v1421_v34  ;;  %v1035_v37 = vpack.c.bf16 %v1033_v33, %v1032_v32  ;;  %v2919_v34 = vld [vmem:[%s3428_s26 + $0x8] sm:$0xff]  }
 0x5b6   : >> { %v1036_v38 = vpack.c.bf16 %v1034_v35, %v1034_v35 }
 0x5b7   : >> { %2746 = vmatprep.mubr.msk.bf16.mxu0 %vm1001_vm4, %v1035_v37 }
 0x5b8   : >> { %2747 = vmatmul.mubr.msk.bf16.vlgmr.msra.gmra.mrb[0].mxu0 %vm1001_vm4, %v1036_v38 }
 0x5b9   : >> { %2751 = vmatpush3.bf16.msra.mxu0 %v2918_v55 }
 0x5bc   : >> { %2783 = vmatmul.mubr.msk.bf16.vlgmr.msra.gmra.mrb[16].mxu1 %vm670_vm1, %v1406_v39 }
 0x5dc   : >> { %v1241_v40 = vpop.xlane.xlu0 %1240 }
 0x5dd   : >> { %v1248_v41 = vsub.f32 %v1236_v12, %v1241_v40 }
 0x5df   : >> { %v1251_v42 = vmul.f32 1.442695, %v1248_v41 }
 0x5e0   : >> { %v1247_v43 = vpop.xlane.xlu0 %1246 }
 0x5e1   : >> { %2968 = vpow2.f32 %v1251_v42  ;;  %v1250_v44 = vsub.f32 %v1238_v13, %v1247_v43 }
 0x5e3   : >> { %v1255_v45 = vmul.f32 1.442695, %v1250_v44 }
 0x5e4   : >> { %v1244_v46 = vpop.xlane.xlu1 %1243 }
 0x5e5   : >> { %2970 = vpow2.f32 %v1255_v45  ;;  %v1249_v47 = vsub.f32 %v1237_v15, %v1244_v46 }
 0x5e7   : >> { %v1253_v48 = vmul.f32 1.442695, %v1249_v47 }
 0x5e9   : >> { %2972 = vpow2.f32 %v1253_v48 }
 0x5eb   : >> { %v2969_v49 = vpop.eup %2968 }
 0x5ec   : >> { %v1257_v50 = vsel %vm1001_vm4, %v2969_v49, 0.0 }
 0x5ed   : >> { %1258 = vadd.xlane.f32.xlu0 %v1257_v50 }
 0x5ef   : >> { %v2971_v51 = vpop.eup %2970 }
 0x5f0   : >> { %v1263_v52 = vsel %vm1001_vm4, %v2971_v51, 0.0 }
 0x5f1   : >> { %1264 = vadd.xlane.f32.xlu1 %v1263_v52 }
 0x5f3   : >> { %v2973_v53 = vpop.eup %2972 }
 0x5f4   : >> { %v1260_v54 = vsel %vm1001_vm4, %v2973_v53, 0.0 }
 0x5f5   : >> { %1261 = vadd.xlane.f32.xlu0 %v1260_v54 }
 0x602   : >> { %1278 = vrot.lane.b32.xlu1 %v3373_v30, %s3109_s4 }
 0x606   : >> { %1640 = vrot.lane.b32.xlu1 %v3360_v21, %s3113_s1 }
 0x60a   : >> { %1642 = vrot.lane.b32.xlu1 %v3369_v28, %s3113_s1  ;;  %s3719_s1 = smov 96  }
 0x60b   : >> { %1276 = vrot.lane.b32.xlu0 %v3362_v22, %s3109_s4  ;;  %s1880_s4 = scalar_lea.vmem %s3678_s12, %s3103_s23 }
 0x60e   : >> { %1638 = vrot.lane.b32.xlu1 %v3369_v28, %s3114_s29 }
 0x60f   : >> { %1636 = vrot.lane.b32.xlu0 %v3360_v21, %s3114_s29 }
 0x67a   : >> { %v1259_v56 = vpop.xlane.xlu0 %1258 }
 0x67b   : >> { %2974 = vrcp.f32 %v1259_v56 }
 0x67e   : >> { %v1265_v57 = vpop.xlane.xlu1 %1264 }
 0x682   : >> { %v1262_v58 = vpop.xlane.xlu0 %1261  ;;  %v1279_v59 = vpop.permute.xlu1 %1278 }
 0x683   : >> { %2976 = vrcp.f32 %v1262_v58  ;;  %v1288_v29 = vsel %vm1045_vm3, %v1279_v59, 0 }
 0x684   : >> { %2978 = vrcp.f32 %v1265_v57 }
 0x685   : >> { %v2975_v1 = vpop.eup %2974 }
 0x686   : >> { %v1277_v60 = vpop.permute.xlu0 %1276  ;;  %v1641_v61 = vpop.permute.xlu1 %1640  ;;  %v1269_v6 = vmul.f32 %v2975_v1, %v2969_v49 }
 0x687   : >> { %v1651_v62 = vsel %vm670_vm1, %v1641_v61, 0  ;;  %2764 = vmatprep.subr.bf16.mxu0 %v1277_v60  ;;  %2843 = vmatprep.subr.msk.bf16.mxu1 %vm670_vm1, %v1641_v61 }
 0x688   : >> { %2801 = vmatpush3.bf16.xpose.msra.mxu1 %v1651_v62 }
 0x68a   : >> { %v1637_v63 = vpop.permute.xlu0 %1636  ;;  %v1643_v28 = vpop.permute.xlu1 %1642 }
 0x68b   : >> { %v2748_v2 = vpop.f32.mrb[0].mxu0  ;;  %2844 = vmatprep.subr.msk.bf16.mxu1 %vm670_vm1, %v1643_v28  ;;  %2804 = vmatprep.mubr.msk.bf16.mxu1 %vm670_vm1, %v1637_v63  ;;  %v1654_v11 = vsel %vm670_vm1, %v1643_v28, 0 }
 0x68c   : >> { %v1083_v21 = vpop.f32.mrb[1].mxu0  ;;  %v1098_v14 = vpack.c.bf16 %v2748_v2, %v2748_v2 }
 0x68d   : >> { %v2977_v3 = vpop.eup %2976  ;;  %v2749_v4 = vpop.f32.mrb[2].mxu0 }
 0x68e   : >> { %v1086_v5 = vpop.f32.mrb[3].mxu0  ;;  %v1270_v9 = vmul.f32 %v2977_v3, %v2973_v53  ;;  %v2979_v17 = vpop.eup %2978 }
 0x68f   : >> { %v1097_v12 = vpack.c.bf16 %v1086_v5, %v1083_v21  ;;  %v2784_v13 = vpop.f32.mrb[16].mxu1  ;;  %v1271_v26 = vmul.f32 %v2979_v17, %v2971_v51  ;;  %v1639_v31 = vpop.permute.xlu1 %1638 }
 0x690   : >> { %v1457_v15 = vpop.f32.mrb[17].mxu1  ;;  %2803 = vmatpush3.bf16.xpose.msra.mxu1 %v1654_v11  ;;  %v1272_v16 = vpack.c.bf16 %v1270_v9, %v1269_v6  ;;  %v1473_v23 = vmul.f32 0.25, %v2784_v13 }
 0x691   : >> { %v1471_v18 = vmul.f32 0.25, %v1457_v15  ;;  %2752 = vmatprep.mubr.msk.bf16.mxu0 %vm670_vm1, %v1097_v12  ;;  %v2785_v19 = vpop.f32.mrb[18].mxu1  ;;  %v1273_v33 = vpack.c.bf16 %v1271_v26, %v1271_v26 }
 0x692   : >> { %2753 = vmatmul.mubr.msk.bf16.vlgmr.msra.gmra.mrb[4].mxu0 %vm670_vm1, %v1098_v14  ;;  %v1460_v20 = vpop.f32.mrb[19].mxu1  ;;  %v1480_v32 = vsel %vm1001_vm4, %v1473_v23, -inf }
 0x693   : >> { %2765 = vmatpush3.bf16.msra.mxu0 %v1277_v60  ;;  %v1472_v24 = vmul.f32 0.25, %v1460_v20  ;;  %2768 = vmatprep.mubr.msk.bf16.mxu0 %vm1001_vm4, %v1272_v16  ;;  %v1474_v25 = vsel %vm1001_vm4, %v1471_v18, -inf }
 0x694   : >> { %2839 = vmatprep.subr.msk.bf16.mxu0 %vm1045_vm3, %v1279_v59  ;;  %1475 = vmax.xlane.f32.xlu0 %v1474_v25 }
 0x695   : >> { %v1477_v27 = vsel %vm1001_vm4, %v1472_v24, -inf }
 0x696   : >> { %1478 = vmax.xlane.f32.xlu1 %v1477_v27 }
 0x697   : >> { %2767 = vmatpush3.bf16.msra.mxu0 %v1288_v29  ;;  %2805 = vmatmul.mubr.msk.bf16.vlgmr.msra.gmra.mrb[20].mxu1 %vm670_vm1, %v1639_v31 }
 0x698   : >> { %1481 = vmax.xlane.f32.xlu0 %v1480_v32  ;;  %2042 = vmatprep.mubr.bf16.mxu1 %v3107_v36 }
 0x699   : >> { %2772 = vmatprep.subr.bf16.mxu0 %v2919_v34 }
 0x69a   : >> { %2769 = vmatmul.mubr.msk.bf16.vlgmr.msra.gmra.mrb[8].mxu0 %vm1001_vm4, %v1273_v33 }
 0x69b   : >> { %2773 = vmatpush3.bf16.msra.mxu0 %v2919_v34 }
 0x721   : >> { %v1476_v35 = vpop.xlane.xlu0 %1475 }
 0x722   : >> { %v1483_v37 = vsub.f32 %v1471_v18, %v1476_v35 }
 0x723   : >> { %v1479_v38 = vpop.xlane.xlu1 %1478 }
 0x724   : >> { %v1486_v39 = vmul.f32 1.442695, %v1483_v37  ;;  %v1484_v40 = vsub.f32 %v1472_v24, %v1479_v38 }
 0x725   : >> { %v1482_v41 = vpop.xlane.xlu0 %1481 }
 0x726   : >> { %2980 = vpow2.f32 %v1486_v39  ;;  %v1488_v42 = vmul.f32 1.442695, %v1484_v40  ;;  %v1485_v43 = vsub.f32 %v1473_v23, %v1482_v41 }
 0x728   : >> { %2982 = vpow2.f32 %v1488_v42  ;;  %v1490_v44 = vmul.f32 1.442695, %v1485_v43  ;;  %v2920_v43 = vld [vmem:[%s3428_s26 + $0x10] sm:$0xff]  }
 0x72a   : >> { %2984 = vpow2.f32 %v1490_v44  ;;  %v2577_v44 = vld [vmem:[%s928_s30] ss:$0 sm:$0xff] }
 0x730   : >> { %v2981_v45 = vpop.eup %2980 }
 0x731   : >> { %v1492_v46 = vsel %vm1001_vm4, %v2981_v45, 0.0 }
 0x732   : >> { %v2983_v47 = vpop.eup %2982  ;;  %1493 = vadd.xlane.f32.xlu0 %v1492_v46 }
 0x733   : >> { %v1495_v50 = vsel %vm1001_vm4, %v2983_v47, 0.0 }
 0x734   : >> { %v2985_v48 = vpop.eup %2984 }
 0x735   : >> { %v1498_v49 = vsel %vm1001_vm4, %v2985_v48, 0.0 }
 0x736   : >> { %1499 = vadd.xlane.f32.xlu1 %v1498_v49  ;;  %1496 = vadd.xlane.f32.xlu0 %v1495_v50 }
 0x747   : >> { %1511 = vrot.lane.b32.xlu1 %v3373_v30, %s3719_s1 }
 0x74c   : >> { %1509 = vrot.lane.b32.xlu0 %v3362_v22, %s3719_s1 }
 0x765   : >> { %v3463_v51 = vpop.f32.mrb[4].mxu0 }
 0x766   : >> { %v3465_v52 = vpop.f32.mrb[5].mxu0 }
 0x767   : >> { %v2755_v53 = vpop.f32.mrb[6].mxu0  ;;  %v1165_v46 = vadd.f32 %v2577_v44, %v3465_v52 }
 0x768   : >> { %v3467_v54 = vpop.f32.mrb[7].mxu0 }
 0x769   : >> { %v1166_v50 = vadd.f32 %v2577_v44, %v3467_v54 }
 0x76a   : >> { %v2806_v55 = vpop.f32.mrb[20].mxu1 }
 0x76b   : >> { %v1690_v56 = vpop.f32.mrb[21].mxu1  ;;  %v1706_v1 = vmul.f32 0.25, %v2806_v55 }
 0x76c   : >> { %v1704_v57 = vmul.f32 0.25, %v1690_v56  ;;  %v2807_v58 = vpop.f32.mrb[22].mxu1 }
 0x76d   : >> { %v2770_v59 = vpop.f32.mrb[8].mxu0  ;;  %v1693_v60 = vpop.f32.mrb[23].mxu1  ;;  %v1713_v5 = vsel %vm1001_vm4, %v1706_v1, -inf }
 0x76e   : >> { %v1705_v61 = vmul.f32 0.25, %v1693_v60  ;;  %v1324_v62 = vpop.f32.mrb[9].mxu0  ;;  %v1707_v63 = vsel %vm1001_vm4, %v1704_v57, -inf  ;;  %v1339_v4 = vpack.c.bf16 %v2770_v59, %v2770_v59 }
 0x76f   : >> { %v2771_v28 = vpop.f32.mrb[10].mxu0  ;;  %1708 = vmax.xlane.f32.xlu1 %v1707_v63 }
 0x770   : >> { %v1327_v2 = vpop.f32.mrb[11].mxu0  ;;  %v1710_v21 = vsel %vm1001_vm4, %v1705_v61, -inf }
 0x771   : >> { %v1338_v3 = vpack.c.bf16 %v1327_v2, %v1324_v62  ;;  %1711 = vmax.xlane.f32.xlu0 %v1710_v21 }
 0x773   : >> { %2774 = vmatprep.mubr.msk.bf16.mxu0 %vm670_vm1, %v1338_v3 }
 0x774   : >> { %2775 = vmatmul.mubr.msk.bf16.vlgmr.msra.gmra.mrb[12].mxu0 %vm670_vm1, %v1339_v4 }
 0x775   : >> { %1714 = vmax.xlane.f32.xlu0 %v1713_v5 }
 0x7bf   : >> { %v1494_v6 = vpop.xlane.xlu0 %1493 }
 0x7c0   : >> { %2986 = vrcp.f32 %v1494_v6 }
 0x7c3   : >> { %v1497_v9 = vpop.xlane.xlu0 %1496  ;;  %v1500_v11 = vpop.xlane.xlu1 %1499 }
 0x7c4   : >> { %2988 = vrcp.f32 %v1497_v9 }
 0x7c5   : >> { %2990 = vrcp.f32 %v1500_v11  ;;  %v2921_v11 = vld [vmem:[%s3428_s26 + $0x18] sm:$0xff]   ;;  %s1878_s26 = scalar_lea.vmem %s3677_s11, %s3103_s23 }
 0x7c7   : >> { %v1510_v12 = vpop.permute.xlu0 %1509  ;;  %v1512_v13 = vpop.permute.xlu1 %1511 }
 0x7c8   : >> { %2786 = vmatprep.subr.bf16.mxu0 %v1510_v12  ;;  %v1521_v15 = vsel %vm1045_vm3, %v1512_v13, 0 }
 0x7c9   : >> { %2787 = vmatpush3.bf16.msra.mxu0 %v1510_v12 }
 0x7ca   : >> { %2842 = vmatprep.subr.msk.bf16.mxu0 %vm1045_vm3, %v1512_v13  ;;  %v2987_v14 = vpop.eup %2986 }
 0x7cb   : >> { %v1504_v18 = vmul.f32 %v2987_v14, %v2981_v45  ;;  %v1167_v45 = vadd.f32 %v3463_v51, %v2577_v44 }
 0x7cd   : >> { %2789 = vmatpush3.bf16.msra.mxu0 %v1521_v15 }
 0x7ce   : >> { %v2989_v16 = vpop.eup %2988  ;;  %2794 = vmatprep.subr.bf16.mxu0 %v2920_v43 }
 0x7cf   : >> { %v2991_v17 = vpop.eup %2990  ;;  %v1505_v19 = vmul.f32 %v2989_v16, %v2983_v47 }
 0x7d0   : >> { %v1506_v20 = vmul.f32 %v2991_v17, %v2985_v48 }
 0x7d1   : >> { %v1507_v23 = vpack.c.bf16 %v1505_v19, %v1504_v18 }
 0x7d2   : >> { %v1508_v24 = vpack.c.bf16 %v1506_v20, %v1506_v20 }
 0x7d3   : >> { %2790 = vmatprep.mubr.msk.bf16.mxu0 %vm1001_vm4, %v1507_v23 }
 0x7d4   : >> { %2791 = vmatmul.mubr.msk.bf16.vlgmr.msra.gmra.mrb[16].mxu0 %vm1001_vm4, %v1508_v24 }
 0x7d5   : >> { %2795 = vmatpush3.bf16.msra.mxu0 %v2920_v43 }
 0x7fc   : >> { %v1709_v25 = vpop.xlane.xlu1 %1708 }
 0x7fd   : >> { %v1716_v29 = vsub.f32 %v1704_v57, %v1709_v25 }
 0x7fe   : >> { %v1712_v26 = vpop.xlane.xlu0 %1711 }
 0x7ff   : >> { %v1717_v27 = vsub.f32 %v1705_v61, %v1712_v26  ;;  %v1719_v34 = vmul.f32 1.442695, %v1716_v29 }
 0x801   : >> { %v1721_v31 = vmul.f32 1.442695, %v1717_v27 }
 0x802   : >> { %v1715_v32 = vpop.xlane.xlu0 %1714 }
 0x803   : >> { %2992 = vpow2.f32 %v1721_v31  ;;  %v1718_v33 = vsub.f32 %v1706_v1, %v1715_v32 }
 0x805   : >> { %v1723_v35 = vmul.f32 1.442695, %v1718_v33 }
 0x807   : >> { %2994 = vpow2.f32 %v1723_v35 }
 0x808   : >> { %2996 = vpow2.f32 %v1719_v34  ;;  %v3022_v34 = vld [vmem:[#allocation2 + $0x10] sm:$0xff] }
 0x80d   : >> { %v2993_v37 = vpop.eup %2992 }
 0x80e   : >> { %v1728_v38 = vsel %vm1001_vm4, %v2993_v37, 0.0 }
 0x80f   : >> { %1729 = vadd.xlane.f32.xlu0 %v1728_v38  ;;  %v3023_v38 = vld [vmem:[#allocation2] sm:$0xff] }
 0x811   : >> { %v2995_v39 = vpop.eup %2994 }
 0x812   : >> { %v1731_v40 = vsel %vm1001_vm4, %v2995_v39, 0.0  ;;  %v2997_v41 = vpop.eup %2996 }
 0x813   : >> { %1732 = vadd.xlane.f32.xlu1 %v1731_v40  ;;  %v1725_v42 = vsel %vm1001_vm4, %v2997_v41, 0.0 }
 0x817   : >> { %1726 = vadd.xlane.f32.xlu1 %v1725_v42 }
 0x825   : >> { %1742 = vrot.lane.b32.xlu0 %v3362_v22, %s3114_s29 }
 0x828   : >> { %1744 = vrot.lane.b32.xlu1 %v3373_v30, %s3114_s29 }
 0x847   : >> { %v2776_v47 = vpop.f32.mrb[12].mxu0 }
 0x848   : >> { %v1402_v48 = vadd.f32 %v2776_v47, %v1167_v45  ;;  %v1386_v49 = vpop.f32.mrb[13].mxu0 }
 0x849   : >> { %v1400_v53 = vadd.f32 %v1386_v49, %v1165_v46  ;;  %v2777_v55 = vpop.f32.mrb[14].mxu0 }
 0x84a   : >> { %v1389_v22 = vpop.f32.mrb[15].mxu0 }
 0x84b   : >> { %v1401_v56 = vadd.f32 %v1389_v22, %v1166_v50 }
 0x89c   : >> { %v1730_v57 = vpop.xlane.xlu0 %1729 }
 0x89d   : >> { %2998 = vrcp.f32 %v1730_v57 }
 0x8a0   : >> { %v1743_v30 = vpop.permute.xlu0 %1742  ;;  %v1733_v58 = vpop.xlane.xlu1 %1732 }
 0x8a1   : >> { %2808 = vmatprep.subr.bf16.mxu0 %v1743_v30  ;;  %3000 = vrcp.f32 %v1733_v58 }
 0x8a4   : >> { %v1727_v59 = vpop.xlane.xlu1 %1726 }
 0x8a5   : >> { %3002 = vrcp.f32 %v1727_v59 }
 0x8a7   : >> { %v2792_v51 = vpop.f32.mrb[16].mxu0  ;;  %v2999_v63 = vpop.eup %2998 }
 0x8a8   : >> { %v1557_v60 = vpop.f32.mrb[17].mxu0  ;;  %v1572_v28 = vpack.c.bf16 %v2792_v51, %v2792_v51  ;;  %v1745_v2 = vpop.permute.xlu1 %1744  ;;  %v1738_v4 = vmul.f32 %v2999_v63, %v2993_v37  ;;  %v2924_v63 = vld [vmem:[%s3328_s22 + $0x4] ss:$8 sps:$4 sm:$0xff]  }
 0x8a9   : >> { %v2793_v52 = vpop.f32.mrb[18].mxu0  ;;  %v1754_v5 = vsel %vm1045_vm3, %v1745_v2, 0  ;;  %2010 = vmatprep.subr.bf16.mxu1 %v2924_v63 }
 0x8aa   : >> { %v1560_v61 = vpop.f32.mrb[19].mxu0 }
 0x8ab   : >> { %v1571_v62 = vpack.c.bf16 %v1560_v61, %v1557_v60  ;;  %v3001_v54 = vpop.eup %3000 }
 0x8ac   : >> { %v1739_v21 = vmul.f32 %v3001_v54, %v2995_v39  ;;  %v2927_v54 = vld [vmem:[%s3328_s22 + $0x14] ss:$8 sps:$4 sm:$0xff]  }
 0x8ad   : >> { %2796 = vmatprep.mubr.msk.bf16.mxu0 %vm670_vm1, %v1571_v62 }
 0x8ae   : >> { %2797 = vmatmul.mubr.msk.bf16.vlgmr.msra.gmra.mrb[20].mxu0 %vm670_vm1, %v1572_v28  ;;  %v1741_v9 = vpack.c.bf16 %v1739_v21, %v1739_v21  ;;  %v2922_v28 = vld [vmem:[%s3328_s22] ss:$8 sps:$4 sm:$0xff]  }
 0x8af   : >> { %v3003_v1 = vpop.eup %3002  ;;  %2809 = vmatpush3.bf16.msra.mxu0 %v1743_v30  ;;  %2011 = vmatpush1.bf16.msra.mxu1 %v2922_v28  ;;  %v2928_v21 = vld [vmem:[%s3328_s22 + $0x20] ss:$8 sps:$4 sm:$0xff]  }
 0x8b0   : >> { %2845 = vmatprep.subr.msk.bf16.mxu0 %vm1045_vm3, %v1745_v2  ;;  %v1737_v3 = vmul.f32 %v3003_v1, %v2997_v41  ;;  %v3024_v41 = vld [vmem:[#allocation2 + $0x8] sm:$0xff]  ;;  %v2925_v1 = vld [vmem:[%s3328_s22 + $0x10] ss:$8 sps:$4 sm:$0xff]   ;;  %2012 = vmatprep.subr.bf16.mxu1 %v2927_v54 }
 0x8b1   : >> { %v2930_v2 = vld [vmem:[%s3328_s22 + $0x24] ss:$8 sps:$4 sm:$0xff]  }
 0x8b2   : >> { %v1740_v6 = vpack.c.bf16 %v1738_v4, %v1737_v3  ;;  %v2933_v3 = vld [vmem:[%s3328_s22 + $0x34] ss:$8 sps:$4 sm:$0xff]   ;;  %v2931_v4 = vld [vmem:[%s3328_s22 + $0x30] ss:$8 sps:$4 sm:$0xff]   ;;  %s2154_s22 = scalar_lea.vmem %s3682_s16, %s3103_s23  ;;  %s727_s23 = sadd.s32 1, %s3103_s23  }
 0x8b3   : >> { %2811 = vmatpush3.bf16.msra.mxu0 %v1754_v5  ;;  %2013 = vmatpush1.bf16.msra.mxu1 %v2925_v1  ;;  %p724_p11 = scmp.ge.s32.totalorder %s727_s23, 2  }
 0x8b4   : >> { %2812 = vmatprep.mubr.msk.bf16.mxu0 %vm1001_vm4, %v1740_v6  ;;  %2816 = vmatprep.subr.bf16.mxu0 %v2921_v11  ;;  %s2648_s30 = sshll.u32 (%p724_p11), %s3249_s3, 8  ;;  %s2459_s29 = sshll.u32 (%p724_p11), %s3306_s27, 4  ;;  %s3619_s29 = int_to_ptr.vmem [resolvable:$true] %s2459_s29 }
 0x8b5   : >> { %2014 = vmatprep.subr.bf16.mxu1 %v2930_v2  ;;  %s3721_s3 = sand.u32 (%p724_p11), 1, %s3091_s25   ;;  %s3033_s23 = scalar_lea.vmem (%p724_p11), %s3619_s29, 256 }
 0x8b6   : >> { %2813 = vmatmul.mubr.msk.bf16.vlgmr.msra.gmra.mrb[24].mxu0 %vm1001_vm4, %v1741_v9  ;;  %p3034_p12 = scmp.ne.s32.totalorder (%p724_p11), %s3619_s29, %s3033_s23  ;;  %s3115_s1 = smov (%p724_p11), [#allocation3]  }
 0x8b7   : >> { %2817 = vmatpush3.bf16.msra.mxu0 %v2921_v11  ;;  %2015 = vmatpush1.bf16.msra.mxu1 %v2928_v21 }
 0x8b8   : >> { %2016 = vmatprep.subr.bf16.mxu1 %v2933_v3  ;;  %p3035_p13 = pnand (%p724_p11), %p3034_p12, %p3266_p5 }
 0x8ba   : > { %p3036_p0 = pneg (%p724_p11), %p3035_p13 }
 0x8bb   : >> { %2017 = vmatpush1.bf16.msra.mxu1 %v2931_v4 }
 0x981   : >> { %v2798_v12 = vpop.f32.mrb[20].mxu0 }
 0x982   : >> { %v1635_v13 = vadd.f32 %v2798_v12, %v1402_v48  ;;  %v1619_v14 = vpop.f32.mrb[21].mxu0 }
 0x983   : >> { %v1633_v15 = vadd.f32 %v1619_v14, %v1400_v53  ;;  %v2799_v16 = vpop.f32.mrb[22].mxu0 }
 0x984   : >> { %v1622_v17 = vpop.f32.mrb[23].mxu0 }
 0x985   : >> { %v1634_v18 = vadd.f32 %v1622_v17, %v1401_v56 }
 0x989   : >> { %v2814_v19 = vpop.f32.mrb[24].mxu0 }
 0x98a   : >> { %v1790_v20 = vpop.f32.mrb[25].mxu0  ;;  %v1805_v26 = vpack.c.bf16 %v2814_v19, %v2814_v19 }
 0x98b   : >> { %v2815_v23 = vpop.f32.mrb[26].mxu0 }
 0x98c   : >> { %v1793_v24 = vpop.f32.mrb[27].mxu0 }
 0x98d   : >> { %v1804_v25 = vpack.c.bf16 %v1793_v24, %v1790_v20 }
 0x98f   : >> { %2818 = vmatprep.mubr.msk.bf16.mxu0 %vm670_vm1, %v1804_v25  ;;  %v2600_v25 = vld [vmem:[%s1880_s4] ss:$0 sm:$0xff]  ;;  %s3037_s4 = sshll.u32 (%p724_p11), %s3115_s1, 4  ;;  %s3038_s4 = int_to_ptr.vmem [resolvable:$false] %s3037_s4 }
 0x990   : >> { %2819 = vmatmul.mubr.msk.bf16.vlgmr.msra.gmra.mrb[28].mxu0 %vm670_vm1, %v1805_v26  ;;  %s3039_s2 = scalar_lea.vmem (%p724_p11), %s3038_s4, 512  ;;  %p3040_p1 = scmp.lt.s32.totalorder (%p724_p11), %s3619_s29, %s3038_s4 }
 0x991   : > { %p3041_p2 = scmp.lt.s32.totalorder (%p724_p11), %s3039_s2, %s3033_s23 }
 0x993   : > { %p3042_p3 = por (%p724_p11), %p3041_p2, %p3040_p1 }
 0x995   : > { %p3043_p4 = pnand (%p724_p11), %p3042_p3, %p3036_p0 }
 0xa63   : >> { %v2820_v27 = vpop.f32.mrb[28].mxu0 }
 0xa64   : >> { %v1868_v29 = vadd.f32 %v2820_v27, %v1635_v13  ;;  %v1852_v31 = vpop.f32.mrb[29].mxu0 }
 0xa65   : >> { %v1866_v32 = vadd.f32 %v1852_v31, %v1633_v15  ;;  %v2821_v33 = vpop.f32.mrb[30].mxu0 }
 0xa66   : >> { %v1871_v35 = vadd.f32 %v3022_v34, %v1868_v29  ;;  %v1855_v37 = vpop.f32.mrb[31].mxu0 }
 0xa67   : >> { %v1869_v39 = vadd.f32 %v3023_v38, %v1866_v32  ;;  %v1867_v40 = vadd.f32 %v1855_v37, %v1634_v18  ;;  %v2599_v18 = vld [vmem:[%s1878_s26] ss:$0 sm:$0xff]  ;;  %s3617_s26 = scalar_lea.hbm (%p724_p11), %s3687_s21, %s2648_s30 }
 0xa68   : >> { %1874 = vst.msk [vmem:[#allocation2 + $0x10] sm:$0xff] %vm718_vm2, %v1871_v35  ;;  %v2934_v38 = vld [vmem:[%s3333_s0 + $0x40] sm:$0xff]  }
 0xa69   : >> { %1872 = vst.msk [vmem:[#allocation2] sm:$0xff] %vm718_vm2, %v1869_v39  ;;  %v1870_v42 = vadd.f32 %v3024_v41, %v1867_v40  ;;  %v2935_v39 = vld [vmem:[%s3333_s0] sm:$0xff]   ;;  %2695 = vmatprep.subr.bf16.mxu0 %v2934_v38  ;;  %v2936_v40 = vld [vmem:[%s3333_s0 + $0x48] sm:$0xff]  }
 0xa6a   : >> { %2696 = vmatpush3.bf16.msra.mxu0 %v2935_v39  ;;  %v2937_v41 = vld [vmem:[%s3333_s0 + $0x8] sm:$0xff]  }
 0xa6b   : >> { %1873 = vst.msk [vmem:[#allocation2 + $0x8] sm:$0xff] %vm718_vm2, %v1870_v42  ;;  %2697 = vmatprep.subr.bf16.mxu0 %v2936_v40  ;;  %v2939_v42 = vld [vmem:[%s3333_s0 + $0x10] sm:$0xff]  }
 0xa6e   : >> { %2698 = vmatpush3.bf16.msra.mxu0 %v2937_v41 }
 0xa6f   : >> { %v3513_v47 = vld [vmem:[#allocation2 + $0x10] sm:$0xff] }
 0xa70   : >> { %v3505_v43 = vld [vmem:[#allocation2] sm:$0xff]  ;;  %v1888_v48 = vsel %vm718_vm2, %v3513_v47, 0.0 }
 0xa71   : >> { %v1882_v44 = vsel %vm718_vm2, %v3505_v43, 0.0 }
 0xa72   : >> { %1883 = vadd.xlane.f32.xlu1 %v1882_v44  ;;  %v3509_v45 = vld [vmem:[#allocation2 + $0x8] sm:$0xff]  ;;  %v2940_v44 = vld [vmem:[%s3333_s0 + $0x58] sm:$0xff]  }
 0xa73   : >> { %v1885_v46 = vsel %vm718_vm2, %v3509_v45, 0.0 }
 0xa74   : >> { %1886 = vadd.xlane.f32.xlu0 %v1885_v46  ;;  %v2941_v46 = vld [vmem:[%s3333_s0 + $0x18] sm:$0xff]  }
 0xa78   : >> { %1889 = vadd.xlane.f32.xlu0 %v1888_v48  ;;  %v2942_v48 = vld [vmem:[%s3333_s0 + $0x60] sm:$0xff]  }
 0xaff   : >> { %v1884_v49 = vpop.xlane.xlu1 %1883 }
 0xb00   : >> { %v1891_v50 = vmul.f32 0.015625, %v1884_v49  ;;  %v2943_v49 = vld [vmem:[%s3333_s0 + $0x20] sm:$0xff]  }
 0xb01   : >> { %v1887_v53 = vpop.xlane.xlu0 %1886 }
 0xb02   : >> { %v1894_v55 = vsub.f32 %v3505_v43, %v1891_v50  ;;  %v1892_v22 = vmul.f32 0.015625, %v1887_v53  ;;  %v2944_v50 = vld [vmem:[%s3333_s0 + $0x68] sm:$0xff]  }
 0xb03   : >> { %v2945_v53 = vld [vmem:[%s3333_s0 + $0x28] sm:$0xff]  }
 0xb04   : >> { %v1895_v56 = vsub.f32 %v3509_v45, %v1892_v22  ;;  %v1897_v57 = vmul.f32 %v1894_v55, %v1894_v55  ;;  %v2947_v22 = vld [vmem:[%s3333_s0 + $0x30] sm:$0xff]  }
 0xb05   : >> { %v1890_v30 = vpop.xlane.xlu0 %1889 }
 0xb06   : >> { %v1893_v58 = vmul.f32 0.015625, %v1890_v30  ;;  %v1900_v59 = vsel %vm718_vm2, %v1897_v57, 0.0  ;;  %v1898_v51 = vmul.f32 %v1895_v56, %v1895_v56  ;;  %v2949_v57 = vld [vmem:[%s3333_s0 + $0x38] sm:$0xff]   ;;  %v1952_v30 = vld [vmem:[%s1951_s24] sm:$0x3] }
 0xb07   : >> { %1901 = vadd.xlane.f32.xlu1 %v1900_v59  ;;  %v1961_v59 = vrot.slane %v1952_v30, %v816_v10 }
 0xb08   : >> { %v1896_v60 = vsub.f32 %v3513_v47, %v1893_v58  ;;  %v1903_v52 = vsel %vm718_vm2, %v1898_v51, 0.0  ;;  %v1957_v58 = vrot.slane %v1952_v30, %v812_v8 }
 0xb09   : >> { %1904 = vadd.xlane.f32.xlu0 %v1903_v52 }
 0xb0a   : >> { %v1899_v61 = vmul.f32 %v1896_v60, %v1896_v60 }
 0xb0c   : >> { %v1906_v62 = vsel %vm718_vm2, %v1899_v61, 0.0 }
 0xb0d   : >> { %1907 = vadd.xlane.f32.xlu1 %v1906_v62 }
 0xb94   : >> { %v1902_v5 = vpop.xlane.xlu1 %1901 }
 0xb95   : >> { %v1909_v6 = vmul.f32 0.015625, %v1902_v5 }
 0xb96   : >> { %v1905_v9 = vpop.xlane.xlu0 %1904 }
 0xb97   : >> { %v1912_v11 = vadd.f32 1e-05, %v1909_v6  ;;  %v1910_v12 = vmul.f32 0.015625, %v1905_v9 }
 0xb99   : >> { %3004 = vrsqrt.f32 %v1912_v11  ;;  %v1913_v13 = vadd.f32 1e-05, %v1910_v12 }
 0xb9a   : >> { %v1908_v14 = vpop.xlane.xlu1 %1907 }
 0xb9b   : >> { %3006 = vrsqrt.f32 %v1913_v13  ;;  %v1911_v15 = vmul.f32 0.015625, %v1908_v14 }
 0xb9d   : >> { %v1914_v16 = vadd.f32 1e-05, %v1911_v15 }
 0xb9f   : >> { %3008 = vrsqrt.f32 %v1914_v16 }
 0xba3   : >> { %v3005_v17 = vpop.eup %3004 }
 0xba4   : >> { %v1918_v19 = vmul.f32 %v3005_v17, %v1894_v55  ;;  %v2946_v55 = vld [vmem:[%s3333_s0 + $0x70] sm:$0xff]  }
 0xba5   : >> { %v3007_v20 = vpop.eup %3006 }
 0xba6   : >> { %v1919_v23 = vmul.f32 %v3007_v20, %v1895_v56  ;;  %v1927_v24 = vmul.f32 %v2599_v18, %v1918_v19  ;;  %v2948_v56 = vld [vmem:[%s3333_s0 + $0x78] sm:$0xff]  }
 0xba8   : >> { %v1928_v26 = vmul.f32 %v2599_v18, %v1919_v23  ;;  %v1936_v29 = vadd.f32 %v2600_v25, %v1927_v24 }
 0xba9   : >> { %v3009_v27 = vpop.eup %3008 }
 0xbaa   : >> { %v1937_v31 = vadd.f32 %v2600_v25, %v1928_v26  ;;  %v1920_v32 = vmul.f32 %v3009_v27, %v1896_v60 }
 0xbac   : >> { %v1939_v33 = vpack.c.bf16 %v1937_v31, %v1936_v29  ;;  %v1929_v34 = vmul.f32 %v2599_v18, %v1920_v32 }
 0xbae   : >> { %2610 = vmatmul.mubr.msk.bf16.vlgmr.msra.gmra.mrb[24].mxu1 %vm718_vm2, %v1939_v33  ;;  %v1938_v35 = vadd.f32 %v2600_v25, %v1929_v34 }
 0xbaf   : >> { %2052 = vmatprep.mubr.bf16.mxu1 %v3107_v36  ;;  %v2938_v36 = vld [vmem:[%s3333_s0 + $0x50] sm:$0xff]  }
 0xbb0   : >> { %v1940_v37 = vpack.c.bf16 %v1938_v35, %v1938_v35  ;;  %2699 = vmatprep.subr.bf16.mxu0 %v2938_v36 }
 0xbb1   : >> { %2700 = vmatpush3.bf16.msra.mxu0 %v2939_v42 }
 0xbb2   : >> { %2701 = vmatprep.subr.bf16.mxu0 %v2940_v44 }
 0xbb5   : >> { %2702 = vmatpush3.bf16.msra.mxu0 %v2941_v46 }
 0xbb6   : >> { %2611 = vmatmul.mubr.msk.bf16.gmra.mrb[28].mxu1 %vm718_vm2, %v1940_v37  ;;  %2703 = vmatprep.subr.bf16.mxu0 %v2942_v48 }
 0xbb9   : >> { %2704 = vmatpush3.bf16.msra.mxu0 %v2943_v49 }
 0xbba   : >> { %2705 = vmatprep.subr.bf16.mxu0 %v2944_v50 }
 0xbbd   : >> { %2706 = vmatpush3.bf16.msra.mxu0 %v2945_v53 }
 0xbbe   : >> { %2707 = vmatprep.subr.bf16.mxu0 %v2946_v55 }
 0xbc1   : >> { %2708 = vmatpush3.bf16.msra.mxu0 %v2947_v22 }
 0xbc2   : >> { %2709 = vmatprep.subr.bf16.mxu0 %v2948_v56 }
 0xbc5   : >> { %2710 = vmatpush3.bf16.msra.mxu0 %v2949_v57 }
 0xbc6   : > { %2822 = vmatprep.subr.bf16.mxu0 (%p724_p11), %v3105_v0 }
 0xc81   : >> { %v2044_v51 = vpop.f32.mrb[24].mxu1 }
 0xc82   : >> { %v2045_v60 = vadd.f32 %v2044_v51, %v1957_v58  ;;  %v2046_v52 = vpop.f32.mrb[25].mxu1 }
 0xc83   : >> { %v2047_v61 = vadd.f32 %v2046_v52, %v1961_v59  ;;  %v2048_v62 = vpop.f32.mrb[26].mxu1 }
 0xc84   : >> { %v2067_v63 = vmul.f32 0.044715, %v2045_v60  ;;  %v2049_v28 = vadd.f32 %v2048_v62, %v1957_v58  ;;  %v2050_v54 = vpop.f32.mrb[27].mxu1  ;;  %v2061_v49 = vmul.f32 0.5, %v2045_v60 }
 0xc85   : >> { %v2068_v1 = vmul.f32 0.044715, %v2047_v61  ;;  %v2051_v2 = vadd.f32 %v2050_v54, %v1961_v59  ;;  %v2062_v55 = vmul.f32 0.5, %v2047_v61 }
 0xc86   : >> { %v2073_v21 = vmul.f32 %v2067_v63, %v2045_v60  ;;  %v2069_v3 = vmul.f32 0.044715, %v2049_v28  ;;  %v2063_v50 = vmul.f32 0.5, %v2049_v28 }
 0xc87   : >> { %v2074_v4 = vmul.f32 %v2068_v1, %v2047_v61  ;;  %v2070_v5 = vmul.f32 0.044715, %v2051_v2  ;;  %v2064_v22 = vmul.f32 0.5, %v2051_v2 }
 0xc88   : >> { %v2079_v6 = vmul.f32 %v2073_v21, %v2045_v60  ;;  %v2075_v9 = vmul.f32 %v2069_v3, %v2049_v28 }
 0xc89   : >> { %v2080_v8 = vmul.f32 %v2074_v4, %v2047_v61  ;;  %v2076_v11 = vmul.f32 %v2070_v5, %v2051_v2  ;;  %v2054_v7 = vpop.f32.mrb[28].mxu1  ;;  %v2614_v5 = vld [vmem:[%s2154_s22] ss:$0 sm:$0xff]  ;;  %s3625_s22 = scalar_lea.sflag (%p724_p11), [#allocation4], %s3721_s3 }
 0xc8a   : >> { %v2085_v10 = vadd.f32 %v2079_v6, %v2045_v60  ;;  %v2081_v12 = vmul.f32 %v2075_v9, %v2049_v28  ;;  %v2055_v13 = vadd.f32 %v2054_v7, %v1957_v58  ;;  %v2056_v14 = vpop.f32.mrb[29].mxu1 }
 0xc8b   : >> { %v2082_v15 = vmul.f32 %v2076_v11, %v2051_v2  ;;  %v2057_v16 = vadd.f32 %v2056_v14, %v1961_v59  ;;  %v2058_v17 = vpop.f32.mrb[30].mxu1  ;;  %v2086_v18 = vadd.f32 %v2080_v8, %v2047_v61 }
 0xc8c   : >> { %v2091_v19 = vmul.f32 0.7978846, %v2085_v10  ;;  %v2087_v20 = vadd.f32 %v2081_v12, %v2049_v28  ;;  %v2071_v23 = vmul.f32 0.044715, %v2055_v13  ;;  %v2059_v24 = vpop.f32.mrb[31].mxu1  ;;  %v2065_v60 = vmul.f32 0.5, %v2055_v13 }
 0xc8d   : >> { %v2072_v25 = vmul.f32 0.044715, %v2057_v16  ;;  %v2088_v26 = vadd.f32 %v2082_v15, %v2051_v2  ;;  %v2092_v27 = vmul.f32 0.7978846, %v2086_v18  ;;  %v2066_v1 = vmul.f32 0.5, %v2057_v16 }
 0xc8e   : >> { %3010 = vtanh.f32 %v2091_v19  ;;  %v2093_v29 = vmul.f32 0.7978846, %v2087_v20  ;;  %v2077_v31 = vmul.f32 %v2071_v23, %v2055_v13 }
 0xc8f   : >> { %v2078_v32 = vmul.f32 %v2072_v25, %v2057_v16  ;;  %v2094_v33 = vmul.f32 0.7978846, %v2088_v26  ;;  %3012 = vtanh.f32 %v2092_v27 }
 0xc90   : >> { %3014 = vtanh.f32 %v2093_v29  ;;  %v2083_v34 = vmul.f32 %v2077_v31, %v2055_v13 }
 0xc91   : >> { %3016 = vtanh.f32 %v2094_v33  ;;  %v2084_v35 = vmul.f32 %v2078_v32, %v2057_v16 }
 0xc92   : >> { %v2089_v37 = vadd.f32 %v2083_v34, %v2055_v13 }
 0xc93   : >> { %v2090_v38 = vadd.f32 %v2084_v35, %v2057_v16 }
 0xc94   : >> { %v2095_v39 = vmul.f32 0.7978846, %v2089_v37 }
 0xc95   : >> { %v2096_v40 = vmul.f32 0.7978846, %v2090_v38  ;;  %v3025_v38 = vld [vmem:[%s3685_s19] sm:$0xff] (%p724_p11)  }
 0xc96   : >> { %3018 = vtanh.f32 %v2095_v39  ;;  %v3026_v39 = vld [vmem:[%s3685_s19 + $0x8] sm:$0xff] (%p724_p11)  }
 0xc97   : >> { %3020 = vtanh.f32 %v2096_v40  ;;  %v3027_v40 = vld [vmem:[%s3685_s19 + $0x10] sm:$0xff] (%p724_p11)  }
 0xc98   : >> { %v3011_v41 = vpop.eup %3010 }
 0xc99   : >> { %v3013_v36 = vpop.eup %3012  ;;  %v2103_v42 = vadd.f32 1.0, %v3011_v41  ;;  %v3028_v41 = vld [vmem:[%s3685_s19 + $0x18] sm:$0xff] (%p724_p11)  }
 0xc9a   : >> { %v3015_v44 = vpop.eup %3014  ;;  %v2104_v46 = vadd.f32 1.0, %v3013_v36 }
 0xc9b   : >> { %v3017_v48 = vpop.eup %3016  ;;  %v2105_v53 = vadd.f32 1.0, %v3015_v44  ;;  %v2109_v57 = vmul.f32 %v2103_v42, %v2061_v49 }
 0xc9c   : >> { %v2106_v56 = vadd.f32 1.0, %v3017_v48  ;;  %v2110_v58 = vmul.f32 %v2104_v46, %v2062_v55  ;;  %v2631_v55 = vld [vmem:[%s3683_s17] ss:$0 sm:$0xff] (%p724_p11) }
 0xc9d   : >> { %v2111_v30 = vmul.f32 %v2105_v53, %v2063_v50 }
 0xc9e   : >> { %v2112_v59 = vmul.f32 %v2106_v56, %v2064_v22 }
 0xc9f   : >> { %v2115_v51 = vpack.c.bf16 %v2111_v30, %v2109_v57  ;;  %v2632_v57 = vld [vmem:[%s3684_s18] ss:$0 sm:$0xff] (%p724_p11) }
 0xca0   : >> { %v3019_v52 = vpop.eup %3018  ;;  %v2116_v62 = vpack.c.bf16 %v2112_v59, %v2110_v58 }
 0xca1   : >> { %v3021_v63 = vpop.eup %3020  ;;  %v2107_v54 = vadd.f32 1.0, %v3019_v52  ;;  %v2633_v52 = vld [vmem:[%s3686_s20] ss:$0 sm:$0xff] (%p724_p11) }
 0xca2   : >> { %2290 = vmatprep.mubr.bf16.mxu0 %v2116_v62  ;;  %v2108_v21 = vadd.f32 1.0, %v3021_v63 }
 0xca3   : >> { %2291 = vmatmul.mubr.bf16.vlgmr.msra.gmra.mrb[32].mxu0 %v2115_v51  ;;  %v2113_v3 = vmul.f32 %v2107_v54, %v2065_v60 }
 0xca4   : >> { %v2114_v28 = vmul.f32 %v2108_v21, %v2066_v1  ;;  %2823 = vmatpush3.bf16.msra.mxu0 (%p724_p11), %v3025_v38 }
 0xca5   : >> { %v2117_v2 = vpack.c.bf16 %v2113_v3, %v2113_v3  ;;  %2824 = vmatprep.subr.bf16.mxu0 (%p724_p11), %v3105_v0 }
 0xca6   : >> { %v2118_v61 = vpack.c.bf16 %v2114_v28, %v2114_v28 }
 0xca8   : >> { %2298 = vmatprep.mubr.bf16.mxu0 %v2118_v61  ;;  %2825 = vmatpush3.bf16.msra.mxu0 (%p724_p11), %v3026_v39 }
 0xca9   : > { %2826 = vmatprep.subr.bf16.mxu0 (%p724_p11), %v3105_v0 }
 0xcab   : >> { %2299 = vmatmul.mubr.bf16.gmra.mrb[36].mxu0 %v2117_v2 }
 0xcac   : > { %2830 = vmatprep.mubr.msk.bf16.mxu0 (%p724_p11), %vm3106_vm0, %v3105_v0  ;;  %2827 = vmatpush3.bf16.msra.mxu0 (%p724_p11), %v3027_v40 }
 0xcad   : > { %2828 = vmatprep.subr.bf16.mxu0 (%p724_p11), %v3105_v0 }
 0xcb0   : > { %2829 = vmatpush3.bf16.msra.mxu0 (%p724_p11), %v3028_v41 }
 0xd76   : >> { %v2711_v4 = vpop.f32.mrb[32].mxu0 }
 0xd77   : >> { %v2712_v6 = vpop.f32.mrb[33].mxu0 }
 0xd78   : >> { %v2713_v9 = vadd.f32 %v2712_v6, %v2711_v4  ;;  %v2714_v8 = vpop.f32.mrb[34].mxu0 }
 0xd79   : >> { %v2715_v11 = vpop.f32.mrb[35].mxu0 }
 0xd7a   : >> { %v2293_v7 = vadd.f32 %v2713_v9, %v2614_v5  ;;  %v2716_v10 = vadd.f32 %v2715_v11, %v2714_v8 }
 0xd7c   : >> { %v2306_v12 = vadd.f32 %v2293_v7, %v3505_v43  ;;  %v2296_v13 = vadd.f32 %v2716_v10, %v2614_v5 }
 0xd7e   : >> { %2309 = vst.msk [vmem:[#allocation2] sm:$0xff] %vm718_vm2, %v2306_v12  ;;  %v2307_v14 = vadd.f32 %v2296_v13, %v3509_v45  ;;  %v2717_v15 = vpop.f32.mrb[36].mxu0 }
 0xd7f   : >> { %v2718_v16 = vpop.f32.mrb[37].mxu0 }
 0xd80   : >> { %2310 = vst.msk [vmem:[#allocation2 + $0x8] sm:$0xff] %vm718_vm2, %v2307_v14  ;;  %v2719_v17 = vadd.f32 %v2718_v16, %v2717_v15  ;;  %v2720_v18 = vpop.f32.mrb[38].mxu0 }
 0xd81   : >> { %v2721_v19 = vpop.f32.mrb[39].mxu0 }
 0xd82   : >> { %v2301_v20 = vadd.f32 %v2719_v17, %v2614_v5 }
 0xd84   : >> { %v2308_v23 = vadd.f32 %v2301_v20, %v3513_v47 }
 0xd85   : > { %726 = sbr.rel (!%p724_p11) target bundleno = 256 (0x100), region = 158  ;;  %v2312_v43 = vld [vmem:[#allocation2] sm:$0xff] (%p724_p11) }
 0xd86   : >> { %2311 = vst.msk [vmem:[#allocation2 + $0x10] sm:$0xff] %vm718_vm2, %v2308_v23  ;;  %v2316_v24 = vsel (%p724_p11), %vm718_vm2, %v2312_v43, 0.0 }
 0xd87   : > { %v2313_v45 = vld [vmem:[#allocation2 + $0x8] sm:$0xff] (%p724_p11)  ;;  %2317 = vadd.xlane.f32.xlu0 (%p724_p11), %v2316_v24 }
 0xd88   : > { %v2319_v47 = vsel (%p724_p11), %vm718_vm2, %v2313_v45, 0.0 }
 0xd8b   : > { %2320 = vadd.xlane.f32.xlu0 (%p724_p11), %v2319_v47 }
 0xe14   : > { %v2318_v25 = vpop.xlane.xlu0 %2317 }
 0xe15   : > { %v2323_v26 = vmul.f32 0.015625, %v2318_v25 }
 0xe17   : > { %v2325_v27 = vsub.f32 %v2312_v43, %v2323_v26 }
 0xe18   : > { %v2321_v29 = vpop.xlane.xlu0 %2320 }
 0xe19   : > { %v2324_v31 = vmul.f32 0.015625, %v2321_v29  ;;  %v2327_v32 = vmul.f32 %v2325_v27, %v2325_v27 }
 0xe1b   : > { %v2326_v33 = vsub.f32 %v2313_v45, %v2324_v31  ;;  %v2329_v34 = vsel %vm718_vm2, %v2327_v32, 0.0 }
 0xe1c   : > { %2330 = vadd.xlane.f32.xlu1 %v2329_v34 }
 0xe1d   : > { %v2328_v35 = vmul.f32 %v2326_v33, %v2326_v33 }
 0xe1f   : > { %v2332_v37 = vsel %vm718_vm2, %v2328_v35, 0.0 }
 0xe20   : > { %2333 = vadd.xlane.f32.xlu1 %v2332_v37 }
 0xea9   : > { %v2331_v36 = vpop.xlane.xlu1 %2330 }
 0xeaa   : > { %v2335_v42 = vmul.f32 0.015625, %v2331_v36 }
 0xeac   : > { %v2337_v44 = vadd.f32 1e-05, %v2335_v42 }
 0xead   : > { %v2334_v46 = vpop.xlane.xlu1 %2333 }
 0xeae   : > { %3029 = vrsqrt.f32 %v2337_v44  ;;  %v2336_v48 = vmul.f32 0.015625, %v2334_v46 }
 0xeb0   : > { %v2338_v49 = vadd.f32 1e-05, %v2336_v48 }
 0xeb2   : > { %3031 = vrsqrt.f32 %v2338_v49 }
 0xeb8   : > { %v3030_v50 = vpop.eup %3029 }
 0xeb9   : > { %v2341_v53 = vmul.f32 %v3030_v50, %v2325_v27 }
 0xebb   : > { %v2349_v0 = vmul.f32 %v2631_v55, %v2341_v53 }
 0xebc   : > { %v3032_v22 = vpop.eup %3031 }
 0xebd   : > { %v2342_v56 = vmul.f32 %v3032_v22, %v2326_v33  ;;  %v2357_v58 = vadd.f32 %v2632_v57, %v2349_v0 }
 0xebf   : > { %v2350_v30 = vmul.f32 %v2631_v55, %v2342_v56 }
 0xec1   : > { %v2358_v59 = vadd.f32 %v2632_v57, %v2350_v30 }
 0xec3   : > { %v2359_v51 = vpack.c.bf16 %v2358_v59, %v2357_v58 }
 0xec5   : > { %2831 = vmatmul.mubr.msk.bf16.vlgmr.msra.gmra.mrb[0].mxu0 %vm718_vm2, %v2359_v51 }
 0xf98   : > { %v2436_v62 = vpop.f32.mrb[0].mxu0 }
 0xf99   : > { %v2437_v63 = vadd.f32 %v2633_v52, %v2436_v62  ;;  %v2832_v54 = vpop.f32.mrb[1].mxu0 }
 0xf9a   : > { %v2439_v1 = vpop.f32.mrb[2].mxu0 }
 0xf9b   : > { %2443 = vst [vmem:[%s3306_s27] sm:$0xff] %v2437_v63  ;;  %v2440_v21 = vadd.f32 %v2633_v52, %v2439_v1  ;;  %v2833_v60 = vpop.f32.mrb[3].mxu0 }
 0xf9d   : > { %2444 = vst [vmem:[%s3306_s27 + $0x8] sm:$0xff] %v2440_v21 }
 0xf9e   : > { %3046 = shalt.err (!%p3043_p4)
}
 0xf9f   : > { %s3047_s27 = scalar_lea.hbm %s3617_s26, 256  ;;  %s3051_s0 = scalar_lea.hbm %s3687_s21, 512 }
 0xfa0   : > { %p3048_p7 = scmp.ne.s32.totalorder %s3617_s26, %s3047_s27  ;;  %p3052_p10 = scmp.lt.u32.totalorder %s3617_s26, %s3687_s21 }
 0xfa1   : > { %p3053_p11 = scmp.lt.u32.totalorder %s3051_s0, %s3047_s27  ;;  %p3055_p13 = scmp.lt.u32.totalorder %s3047_s27, %s3617_s26 }
 0xfa2   : > { %p3049_p8 = pnand %p3048_p7, %p3266_p5 }
 0xfa3   : > { %p3054_p12 = por %p3053_p11, %p3052_p10 }
 0xfa4   : > { %p3050_p9 = pneg %p3049_p8 }
 0xfa5   : > { %p3056_p0 = por %p3055_p13, %p3054_p12 }
 0xfa7   : > { %p3057_p1 = pnand %p3056_p0, %p3050_p9 }
 0xfa9   : > { %3060 = shalt.err (!%p3057_p1)
}
 0xfaa   : > { %s3116_s23 = smov 128   ;;  %s3117_s4 = smov 8  }
 0xfab   : > { %2846 = dma.vmem_to_hbm [thread:$0]  (%p3266_p5), %s3619_s29, 256, %s3617_s26, %s3625_s22, %s3116_s23, %s3116_s23, %s3117_s4  }
 0xfac PF: > { %s3722_s2 = sld [smem:[#allocation8_spill]]  ;;  %s3723_s30 = sld [smem:[#allocation6_spill]] }
 0xfb2   : > { %p2852_p2 = scmp.ge.s32.totalorder %s3722_s2, 2  ;;  %s2474_s3 = sand.u32 1, %s3723_s30  }
 0xfb3   : > { %s2475_s27 = scalar_lea.sflag [#allocation4], %s2474_s3 }
 0xfb4   : > { %p2849_p3 = pnand %p2852_p2, %p3270_p6 }
 0xfb6   : > { %3082 = dma.done.wait (!%p2849_p3), %s2475_s27, 256  }
 0xfb7   : > { %3084 = vsyncadd (!%p2849_p3), %s2475_s27, 4294967040  ;;  %s3725_s27 = sld [smem:[#allocation9_spill]]  ;;  %s3726_s0 = sld [smem:[#allocation7_spill]] }
 0xfb8   : > { %s3727_s26 = sld [smem:[#allocation10_spill]]  ;;  %s3728_s2 = smov %s3091_s25 }
 0xfbd   : > { %p31_p4 = scmp.ge.s32.totalorder %s3725_s27, 4   ;;  %s3729_s25 = smov %s3726_s0 }
 0xfbf   :  { %33 = sbr.rel (!%p31_p4) target bundleno = 10 (0xa), region = 169 }
 0xfc6   :  { %2480 = vsyncpa [#allocation4], 1 }
 0xfc7   :  { %2482 = vsyncpa [#allocation4 + $0x1], 1 }

</bundles_post_ra>
